<compile_context>
chip_gen: v7x
topology: tpu7x:2x2x1
jax: 0.10.0
libtpu: 0.0.40
codegen_flags: <defaults>
</compile_context>

<pallas_src>
import jax
import jax.numpy as jnp
from jax.experimental import pallas as pl
from jax.experimental.pallas import tpu as pltpu


def lstm_annex_kernel(x_ref, wih_ref, whh_ref, b_ref, wlin_ref, blin_ref, out_ref):
    """Single-invocation kernel: full LSTM recurrence + linear + log_softmax.

    x_ref:    (S*BP, V)  time-major input, flattened over (time, padded batch)
    wih_ref:  (V, 4H)    input->gates weight (pre-transposed PyTorch weight_ih)
    whh_ref:  (H, 4H)    hidden->gates weight (pre-transposed PyTorch weight_hh)
    b_ref:    (1, 4H)    combined bias (b_ih + b_hh)
    wlin_ref: (H, C)     final linear weight (pre-transposed)
    blin_ref: (1, C)     final linear bias
    out_ref:  (BP, C)    log_softmax(lin(h_T)), padded batch rows included
    """
    BP = out_ref.shape[0]                 # padded batch (multiple of 8 sublanes)
    S = x_ref.shape[0] // BP
    H = whh_ref.shape[0]
    hp = jax.lax.Precision.HIGHEST

    # --- Hoisted input projection: one big MXU matmul, bias folded in. -------
    xg = (jnp.dot(x_ref[...], wih_ref[...],
                  preferred_element_type=jnp.float32, precision=hp)
          + b_ref[...])                                   # (S*BP, 4H)

    whh = whh_ref[...]                                    # (H, 4H), loaded once

    # --- Recurrence: statically unrolled (S is small), h/c live in vregs. ----
    h = jnp.zeros((BP, H), jnp.float32)
    c = jnp.zeros((BP, H), jnp.float32)
    for t in range(S):  # compile-time constant trip count -> fully unrolled
        gates = (xg[t * BP:(t + 1) * BP, :]               # sublane-aligned slice
                 + jnp.dot(h, whh, preferred_element_type=jnp.float32,
                           precision=hp))                 # (BP, 4H)
        # Full-vreg nonlinearities: 2 EUP pushes/step instead of 4 partial ones.
        sig_all = jax.nn.sigmoid(gates)
        tanh_all = jnp.tanh(gates)
        i_g = sig_all[:, 0 * H:1 * H]
        f_g = sig_all[:, 1 * H:2 * H]
        g_g = tanh_all[:, 2 * H:3 * H]
        o_g = sig_all[:, 3 * H:4 * H]
        c = f_g * c + i_g * g_g
        h = o_g * jnp.tanh(c)

    # --- Fused epilogue: Linear + log_softmax over classes. ------------------
    logits = (jnp.dot(h, wlin_ref[...], preferred_element_type=jnp.float32,
                      precision=hp)
              + blin_ref[...])                            # (BP, C)
    m = jnp.max(logits, axis=-1, keepdims=True)
    shifted = logits - m
    lse = jnp.log(jnp.sum(jnp.exp(shifted), axis=-1, keepdims=True))
    out_ref[...] = shifted - lse


def prepare_params(params):
    """One-time weight prep: transposes + bias combine hoisted out of forward."""
    H = params["w_hh"].shape[1]
    C = params["w_lin"].shape[0]
    return {
        "wih_t": jnp.transpose(params["w_ih"]),                   # (V, 4H)
        "whh_t": jnp.transpose(params["w_hh"]),                   # (H, 4H)
        "b": (params["b_ih"] + params["b_hh"]).reshape(1, 4 * H), # (1, 4H)
        "wlin_t": jnp.transpose(params["w_lin"]),                 # (H, C)
        "blin": params["b_lin"].reshape(1, C),                    # (1, C)
    }


def lstm_annex_forward(x, prep):
    """x: (batch, seq_len, vocab) float32.  Returns (batch, num_classes) log-probs."""
    B, S, V = x.shape
    H = prep["whh_t"].shape[0]
    C = prep["wlin_t"].shape[1]

    # Pad batch to a full sublane tile (multiple of 8); slice off after the call.
    BP = ((B + 7) // 8) * 8
    x_tm = jnp.transpose(x, (1, 0, 2))                     # (S, B, V) time-major
    if BP != B:
        x_tm = jnp.pad(x_tm, ((0, 0), (0, BP - B), (0, 0)))
    x_flat = x_tm.reshape(S * BP, V)                       # (S*BP, V)

    vmem = pl.BlockSpec(memory_space=pltpu.MemorySpace.VMEM)
    out_pad = pl.pallas_call(
        lstm_annex_kernel,
        out_shape=jax.ShapeDtypeStruct((BP, C), jnp.float32),
        in_specs=[vmem] * 6,
        out_specs=vmem,
        compiler_params=pltpu.CompilerParams(vmem_limit_bytes=16 * 1024 * 1024),
    )(x_flat, prep["wih_t"], prep["whh_t"], prep["b"], prep["wlin_t"], prep["blin"])
    return out_pad[:B]


def make_params(key, vocab_size, hidden_dim, num_classes):
    """All parameters ~ Normal(0, 0.02), matching init_parameters()."""
    ks = jax.random.split(key, 6)
    std = 0.02
    return {
        "w_ih": jax.random.normal(ks[0], (4 * hidden_dim, vocab_size), jnp.float32) * std,
        "w_hh": jax.random.normal(ks[1], (4 * hidden_dim, hidden_dim), jnp.float32) * std,
        "b_ih": jax.random.normal(ks[2], (4 * hidden_dim,), jnp.float32) * std,
        "b_hh": jax.random.normal(ks[3], (4 * hidden_dim,), jnp.float32) * std,
        "w_lin": jax.random.normal(ks[4], (num_classes, hidden_dim), jnp.float32) * std,
        "b_lin": jax.random.normal(ks[5], (num_classes,), jnp.float32) * std,
    }


def reference_forward(x, params):
    """Pure-JAX reference (PyTorch nn.LSTM semantics, gate order i,f,g,o)."""
    B, S, V = x.shape
    H = params["w_hh"].shape[1]
    wih_t = params["w_ih"].T
    whh_t = params["w_hh"].T
    b = params["b_ih"] + params["b_hh"]

    def step(carry, x_t):
        h, c = carry
        gates = x_t @ wih_t + h @ whh_t + b
        i = jax.nn.sigmoid(gates[:, 0 * H:1 * H])
        f = jax.nn.sigmoid(gates[:, 1 * H:2 * H])
        g = jnp.tanh(gates[:, 2 * H:3 * H])
        o = jax.nn.sigmoid(gates[:, 3 * H:4 * H])
        c_new = f * c + i * g
        h_new = o * jnp.tanh(c_new)
        return (h_new, c_new), None

    h0 = jnp.zeros((B, H), jnp.float32)
    c0 = jnp.zeros((B, H), jnp.float32)
    (h_T, _), _ = jax.lax.scan(step, (h0, c0), jnp.transpose(x, (1, 0, 2)))
    logits = h_T @ params["w_lin"].T + params["b_lin"]
    return jax.nn.log_softmax(logits, axis=-1)


if __name__ == "__main__":
    # Small shapes consistent with the module's forward:
    # x: (batch_size, g_sequence_len, vocab_size)
    batch_size, g_sequence_len, vocab_size = 4, 8, 16
    hidden_dim, num_classes = 32, 8

    key = jax.random.PRNGKey(0)
    k_x, k_p = jax.random.split(key)
    x = jax.random.normal(k_x, (batch_size, g_sequence_len, vocab_size), jnp.float32)
    params = make_params(k_p, vocab_size, hidden_dim, num_classes)
    prep = prepare_params(params)   # one-time: transposes + bias combine

    out = lstm_annex_forward(x, prep)
    out = jax.block_until_ready(out)

    ref = reference_forward(x, params)
    assert out.shape == (batch_size, num_classes)
    assert jnp.allclose(out, ref, atol=1e-5, rtol=1e-5), "mismatch vs reference"

    print("KERNEL_OK")
</pallas_src>

<mosaic_0001>
module attributes {stable_mosaic.version = 11 : i64} {
  func.func @lstm_annex_kernel(%arg0: memref<64x16xf32, #tpu.memory_space<vmem>>, %arg1: memref<16x128xf32, #tpu.memory_space<vmem>>, %arg2: memref<32x128xf32, #tpu.memory_space<vmem>>, %arg3: memref<1x128xf32, #tpu.memory_space<vmem>>, %arg4: memref<32x8xf32, #tpu.memory_space<vmem>>, %arg5: memref<1x8xf32, #tpu.memory_space<vmem>>, %arg6: memref<8x8xf32, #tpu.memory_space<vmem>>) attributes {dimension_semantics = [], scalar_prefetch = 0 : i64, scratch_operands = 0 : i64, tpu.core_type = #tpu.core_type<tc>} {
    %c0 = arith.constant 0 : index
    %c0_0 = arith.constant 0 : index
    %0 = vector.load %arg0[%c0, %c0_0] : memref<64x16xf32, #tpu.memory_space<vmem>>, vector<64x16xf32>
    %c0_1 = arith.constant 0 : index
    %c0_2 = arith.constant 0 : index
    %1 = vector.load %arg1[%c0_1, %c0_2] : memref<16x128xf32, #tpu.memory_space<vmem>>, vector<16x128xf32>
    %cst = arith.constant dense<0.000000e+00> : vector<64x128xf32>
    %2 = tpu.matmul %0, %1, %cst {dimension_numbers = #tpu.dot_dimension_numbers<[1], [0], [0], [1], [0, 0, 1, 1], [], []>, precision = #tpu.contract_precision<fp32>} : vector<64x16xf32>, vector<16x128xf32>, vector<64x128xf32> -> vector<64x128xf32>
    %c0_3 = arith.constant 0 : index
    %c0_4 = arith.constant 0 : index
    %3 = vector.load %arg3[%c0_3, %c0_4] : memref<1x128xf32, #tpu.memory_space<vmem>>, vector<1x128xf32>
    %4 = vector.broadcast %3 : vector<1x128xf32> to vector<64x128xf32>
    %5 = arith.addf %2, %4 : vector<64x128xf32>
    %c0_5 = arith.constant 0 : index
    %c0_6 = arith.constant 0 : index
    %6 = vector.load %arg2[%c0_5, %c0_6] : memref<32x128xf32, #tpu.memory_space<vmem>>, vector<32x128xf32>
    %cst_7 = arith.constant 0.000000e+00 : f32
    %7 = vector.broadcast %cst_7 : f32 to vector<8x32xf32>
    %cst_8 = arith.constant 0.000000e+00 : f32
    %8 = vector.broadcast %cst_8 : f32 to vector<8x32xf32>
    %9 = vector.extract_strided_slice %5 {offsets = [0, 0], sizes = [8, 128], strides = [1, 1]} : vector<64x128xf32> to vector<8x128xf32>
    %cst_9 = arith.constant dense<0.000000e+00> : vector<8x128xf32>
    %10 = tpu.matmul %7, %6, %cst_9 {dimension_numbers = #tpu.dot_dimension_numbers<[1], [0], [0], [1], [0, 0, 1, 1], [], []>, precision = #tpu.contract_precision<fp32>} : vector<8x32xf32>, vector<32x128xf32>, vector<8x128xf32> -> vector<8x128xf32>
    %11 = arith.addf %9, %10 : vector<8x128xf32>
    %12 = arith.negf %11 : vector<8x128xf32>
    %13 = math.exp %12 : vector<8x128xf32>
    %cst_10 = arith.constant 1.000000e+00 : f32
    %14 = vector.broadcast %cst_10 : f32 to vector<8x128xf32>
    %15 = arith.addf %14, %13 : vector<8x128xf32>
    %16 = arith.divf %14, %15 : vector<8x128xf32>
    %17 = math.tanh %11 : vector<8x128xf32>
    %18 = vector.extract_strided_slice %16 {offsets = [0, 0], sizes = [8, 32], strides = [1, 1]} : vector<8x128xf32> to vector<8x32xf32>
    %19 = vector.extract_strided_slice %16 {offsets = [0, 32], sizes = [8, 32], strides = [1, 1]} : vector<8x128xf32> to vector<8x32xf32>
    %20 = vector.extract_strided_slice %17 {offsets = [0, 64], sizes = [8, 32], strides = [1, 1]} : vector<8x128xf32> to vector<8x32xf32>
    %21 = vector.extract_strided_slice %16 {offsets = [0, 96], sizes = [8, 32], strides = [1, 1]} : vector<8x128xf32> to vector<8x32xf32>
    %22 = arith.mulf %19, %8 : vector<8x32xf32>
    %23 = arith.mulf %18, %20 : vector<8x32xf32>
    %24 = arith.addf %22, %23 : vector<8x32xf32>
    %25 = math.tanh %24 : vector<8x32xf32>
    %26 = arith.mulf %21, %25 : vector<8x32xf32>
    %27 = vector.extract_strided_slice %5 {offsets = [8, 0], sizes = [8, 128], strides = [1, 1]} : vector<64x128xf32> to vector<8x128xf32>
    %cst_11 = arith.constant dense<0.000000e+00> : vector<8x128xf32>
    %28 = tpu.matmul %26, %6, %cst_11 {dimension_numbers = #tpu.dot_dimension_numbers<[1], [0], [0], [1], [0, 0, 1, 1], [], []>, precision = #tpu.contract_precision<fp32>} : vector<8x32xf32>, vector<32x128xf32>, vector<8x128xf32> -> vector<8x128xf32>
    %29 = arith.addf %27, %28 : vector<8x128xf32>
    %30 = arith.negf %29 : vector<8x128xf32>
    %31 = math.exp %30 : vector<8x128xf32>
    %cst_12 = arith.constant 1.000000e+00 : f32
    %32 = vector.broadcast %cst_12 : f32 to vector<8x128xf32>
    %33 = arith.addf %32, %31 : vector<8x128xf32>
    %34 = arith.divf %32, %33 : vector<8x128xf32>
    %35 = math.tanh %29 : vector<8x128xf32>
    %36 = vector.extract_strided_slice %34 {offsets = [0, 0], sizes = [8, 32], strides = [1, 1]} : vector<8x128xf32> to vector<8x32xf32>
    %37 = vector.extract_strided_slice %34 {offsets = [0, 32], sizes = [8, 32], strides = [1, 1]} : vector<8x128xf32> to vector<8x32xf32>
    %38 = vector.extract_strided_slice %35 {offsets = [0, 64], sizes = [8, 32], strides = [1, 1]} : vector<8x128xf32> to vector<8x32xf32>
    %39 = vector.extract_strided_slice %34 {offsets = [0, 96], sizes = [8, 32], strides = [1, 1]} : vector<8x128xf32> to vector<8x32xf32>
    %40 = arith.mulf %37, %24 : vector<8x32xf32>
    %41 = arith.mulf %36, %38 : vector<8x32xf32>
    %42 = arith.addf %40, %41 : vector<8x32xf32>
    %43 = math.tanh %42 : vector<8x32xf32>
    %44 = arith.mulf %39, %43 : vector<8x32xf32>
    %45 = vector.extract_strided_slice %5 {offsets = [16, 0], sizes = [8, 128], strides = [1, 1]} : vector<64x128xf32> to vector<8x128xf32>
    %cst_13 = arith.constant dense<0.000000e+00> : vector<8x128xf32>
    %46 = tpu.matmul %44, %6, %cst_13 {dimension_numbers = #tpu.dot_dimension_numbers<[1], [0], [0], [1], [0, 0, 1, 1], [], []>, precision = #tpu.contract_precision<fp32>} : vector<8x32xf32>, vector<32x128xf32>, vector<8x128xf32> -> vector<8x128xf32>
    %47 = arith.addf %45, %46 : vector<8x128xf32>
    %48 = arith.negf %47 : vector<8x128xf32>
    %49 = math.exp %48 : vector<8x128xf32>
    %cst_14 = arith.constant 1.000000e+00 : f32
    %50 = vector.broadcast %cst_14 : f32 to vector<8x128xf32>
    %51 = arith.addf %50, %49 : vector<8x128xf32>
    %52 = arith.divf %50, %51 : vector<8x128xf32>
    %53 = math.tanh %47 : vector<8x128xf32>
    %54 = vector.extract_strided_slice %52 {offsets = [0, 0], sizes = [8, 32], strides = [1, 1]} : vector<8x128xf32> to vector<8x32xf32>
    %55 = vector.extract_strided_slice %52 {offsets = [0, 32], sizes = [8, 32], strides = [1, 1]} : vector<8x128xf32> to vector<8x32xf32>
    %56 = vector.extract_strided_slice %53 {offsets = [0, 64], sizes = [8, 32], strides = [1, 1]} : vector<8x128xf32> to vector<8x32xf32>
    %57 = vector.extract_strided_slice %52 {offsets = [0, 96], sizes = [8, 32], strides = [1, 1]} : vector<8x128xf32> to vector<8x32xf32>
    %58 = arith.mulf %55, %42 : vector<8x32xf32>
    %59 = arith.mulf %54, %56 : vector<8x32xf32>
    %60 = arith.addf %58, %59 : vector<8x32xf32>
    %61 = math.tanh %60 : vector<8x32xf32>
    %62 = arith.mulf %57, %61 : vector<8x32xf32>
    %63 = vector.extract_strided_slice %5 {offsets = [24, 0], sizes = [8, 128], strides = [1, 1]} : vector<64x128xf32> to vector<8x128xf32>
    %cst_15 = arith.constant dense<0.000000e+00> : vector<8x128xf32>
    %64 = tpu.matmul %62, %6, %cst_15 {dimension_numbers = #tpu.dot_dimension_numbers<[1], [0], [0], [1], [0, 0, 1, 1], [], []>, precision = #tpu.contract_precision<fp32>} : vector<8x32xf32>, vector<32x128xf32>, vector<8x128xf32> -> vector<8x128xf32>
    %65 = arith.addf %63, %64 : vector<8x128xf32>
    %66 = arith.negf %65 : vector<8x128xf32>
    %67 = math.exp %66 : vector<8x128xf32>
    %cst_16 = arith.constant 1.000000e+00 : f32
    %68 = vector.broadcast %cst_16 : f32 to vector<8x128xf32>
    %69 = arith.addf %68, %67 : vector<8x128xf32>
    %70 = arith.divf %68, %69 : vector<8x128xf32>
    %71 = math.tanh %65 : vector<8x128xf32>
    %72 = vector.extract_strided_slice %70 {offsets = [0, 0], sizes = [8, 32], strides = [1, 1]} : vector<8x128xf32> to vector<8x32xf32>
    %73 = vector.extract_strided_slice %70 {offsets = [0, 32], sizes = [8, 32], strides = [1, 1]} : vector<8x128xf32> to vector<8x32xf32>
    %74 = vector.extract_strided_slice %71 {offsets = [0, 64], sizes = [8, 32], strides = [1, 1]} : vector<8x128xf32> to vector<8x32xf32>
    %75 = vector.extract_strided_slice %70 {offsets = [0, 96], sizes = [8, 32], strides = [1, 1]} : vector<8x128xf32> to vector<8x32xf32>
    %76 = arith.mulf %73, %60 : vector<8x32xf32>
    %77 = arith.mulf %72, %74 : vector<8x32xf32>
    %78 = arith.addf %76, %77 : vector<8x32xf32>
    %79 = math.tanh %78 : vector<8x32xf32>
    %80 = arith.mulf %75, %79 : vector<8x32xf32>
    %81 = vector.extract_strided_slice %5 {offsets = [32, 0], sizes = [8, 128], strides = [1, 1]} : vector<64x128xf32> to vector<8x128xf32>
    %cst_17 = arith.constant dense<0.000000e+00> : vector<8x128xf32>
    %82 = tpu.matmul %80, %6, %cst_17 {dimension_numbers = #tpu.dot_dimension_numbers<[1], [0], [0], [1], [0, 0, 1, 1], [], []>, precision = #tpu.contract_precision<fp32>} : vector<8x32xf32>, vector<32x128xf32>, vector<8x128xf32> -> vector<8x128xf32>
    %83 = arith.addf %81, %82 : vector<8x128xf32>
    %84 = arith.negf %83 : vector<8x128xf32>
    %85 = math.exp %84 : vector<8x128xf32>
    %cst_18 = arith.constant 1.000000e+00 : f32
    %86 = vector.broadcast %cst_18 : f32 to vector<8x128xf32>
    %87 = arith.addf %86, %85 : vector<8x128xf32>
    %88 = arith.divf %86, %87 : vector<8x128xf32>
    %89 = math.tanh %83 : vector<8x128xf32>
    %90 = vector.extract_strided_slice %88 {offsets = [0, 0], sizes = [8, 32], strides = [1, 1]} : vector<8x128xf32> to vector<8x32xf32>
    %91 = vector.extract_strided_slice %88 {offsets = [0, 32], sizes = [8, 32], strides = [1, 1]} : vector<8x128xf32> to vector<8x32xf32>
    %92 = vector.extract_strided_slice %89 {offsets = [0, 64], sizes = [8, 32], strides = [1, 1]} : vector<8x128xf32> to vector<8x32xf32>
    %93 = vector.extract_strided_slice %88 {offsets = [0, 96], sizes = [8, 32], strides = [1, 1]} : vector<8x128xf32> to vector<8x32xf32>
    %94 = arith.mulf %91, %78 : vector<8x32xf32>
    %95 = arith.mulf %90, %92 : vector<8x32xf32>
    %96 = arith.addf %94, %95 : vector<8x32xf32>
    %97 = math.tanh %96 : vector<8x32xf32>
    %98 = arith.mulf %93, %97 : vector<8x32xf32>
    %99 = vector.extract_strided_slice %5 {offsets = [40, 0], sizes = [8, 128], strides = [1, 1]} : vector<64x128xf32> to vector<8x128xf32>
    %cst_19 = arith.constant dense<0.000000e+00> : vector<8x128xf32>
    %100 = tpu.matmul %98, %6, %cst_19 {dimension_numbers = #tpu.dot_dimension_numbers<[1], [0], [0], [1], [0, 0, 1, 1], [], []>, precision = #tpu.contract_precision<fp32>} : vector<8x32xf32>, vector<32x128xf32>, vector<8x128xf32> -> vector<8x128xf32>
    %101 = arith.addf %99, %100 : vector<8x128xf32>
    %102 = arith.negf %101 : vector<8x128xf32>
    %103 = math.exp %102 : vector<8x128xf32>
    %cst_20 = arith.constant 1.000000e+00 : f32
    %104 = vector.broadcast %cst_20 : f32 to vector<8x128xf32>
    %105 = arith.addf %104, %103 : vector<8x128xf32>
    %106 = arith.divf %104, %105 : vector<8x128xf32>
    %107 = math.tanh %101 : vector<8x128xf32>
    %108 = vector.extract_strided_slice %106 {offsets = [0, 0], sizes = [8, 32], strides = [1, 1]} : vector<8x128xf32> to vector<8x32xf32>
    %109 = vector.extract_strided_slice %106 {offsets = [0, 32], sizes = [8, 32], strides = [1, 1]} : vector<8x128xf32> to vector<8x32xf32>
    %110 = vector.extract_strided_slice %107 {offsets = [0, 64], sizes = [8, 32], strides = [1, 1]} : vector<8x128xf32> to vector<8x32xf32>
    %111 = vector.extract_strided_slice %106 {offsets = [0, 96], sizes = [8, 32], strides = [1, 1]} : vector<8x128xf32> to vector<8x32xf32>
    %112 = arith.mulf %109, %96 : vector<8x32xf32>
    %113 = arith.mulf %108, %110 : vector<8x32xf32>
    %114 = arith.addf %112, %113 : vector<8x32xf32>
    %115 = math.tanh %114 : vector<8x32xf32>
    %116 = arith.mulf %111, %115 : vector<8x32xf32>
    %117 = vector.extract_strided_slice %5 {offsets = [48, 0], sizes = [8, 128], strides = [1, 1]} : vector<64x128xf32> to vector<8x128xf32>
    %cst_21 = arith.constant dense<0.000000e+00> : vector<8x128xf32>
    %118 = tpu.matmul %116, %6, %cst_21 {dimension_numbers = #tpu.dot_dimension_numbers<[1], [0], [0], [1], [0, 0, 1, 1], [], []>, precision = #tpu.contract_precision<fp32>} : vector<8x32xf32>, vector<32x128xf32>, vector<8x128xf32> -> vector<8x128xf32>
    %119 = arith.addf %117, %118 : vector<8x128xf32>
    %120 = arith.negf %119 : vector<8x128xf32>
    %121 = math.exp %120 : vector<8x128xf32>
    %cst_22 = arith.constant 1.000000e+00 : f32
    %122 = vector.broadcast %cst_22 : f32 to vector<8x128xf32>
    %123 = arith.addf %122, %121 : vector<8x128xf32>
    %124 = arith.divf %122, %123 : vector<8x128xf32>
    %125 = math.tanh %119 : vector<8x128xf32>
    %126 = vector.extract_strided_slice %124 {offsets = [0, 0], sizes = [8, 32], strides = [1, 1]} : vector<8x128xf32> to vector<8x32xf32>
    %127 = vector.extract_strided_slice %124 {offsets = [0, 32], sizes = [8, 32], strides = [1, 1]} : vector<8x128xf32> to vector<8x32xf32>
    %128 = vector.extract_strided_slice %125 {offsets = [0, 64], sizes = [8, 32], strides = [1, 1]} : vector<8x128xf32> to vector<8x32xf32>
    %129 = vector.extract_strided_slice %124 {offsets = [0, 96], sizes = [8, 32], strides = [1, 1]} : vector<8x128xf32> to vector<8x32xf32>
    %130 = arith.mulf %127, %114 : vector<8x32xf32>
    %131 = arith.mulf %126, %128 : vector<8x32xf32>
    %132 = arith.addf %130, %131 : vector<8x32xf32>
    %133 = math.tanh %132 : vector<8x32xf32>
    %134 = arith.mulf %129, %133 : vector<8x32xf32>
    %135 = vector.extract_strided_slice %5 {offsets = [56, 0], sizes = [8, 128], strides = [1, 1]} : vector<64x128xf32> to vector<8x128xf32>
    %cst_23 = arith.constant dense<0.000000e+00> : vector<8x128xf32>
    %136 = tpu.matmul %134, %6, %cst_23 {dimension_numbers = #tpu.dot_dimension_numbers<[1], [0], [0], [1], [0, 0, 1, 1], [], []>, precision = #tpu.contract_precision<fp32>} : vector<8x32xf32>, vector<32x128xf32>, vector<8x128xf32> -> vector<8x128xf32>
    %137 = arith.addf %135, %136 : vector<8x128xf32>
    %138 = arith.negf %137 : vector<8x128xf32>
    %139 = math.exp %138 : vector<8x128xf32>
    %cst_24 = arith.constant 1.000000e+00 : f32
    %140 = vector.broadcast %cst_24 : f32 to vector<8x128xf32>
    %141 = arith.addf %140, %139 : vector<8x128xf32>
    %142 = arith.divf %140, %141 : vector<8x128xf32>
    %143 = math.tanh %137 : vector<8x128xf32>
    %144 = vector.extract_strided_slice %142 {offsets = [0, 0], sizes = [8, 32], strides = [1, 1]} : vector<8x128xf32> to vector<8x32xf32>
    %145 = vector.extract_strided_slice %142 {offsets = [0, 32], sizes = [8, 32], strides = [1, 1]} : vector<8x128xf32> to vector<8x32xf32>
    %146 = vector.extract_strided_slice %143 {offsets = [0, 64], sizes = [8, 32], strides = [1, 1]} : vector<8x128xf32> to vector<8x32xf32>
    %147 = vector.extract_strided_slice %142 {offsets = [0, 96], sizes = [8, 32], strides = [1, 1]} : vector<8x128xf32> to vector<8x32xf32>
    %148 = arith.mulf %145, %132 : vector<8x32xf32>
    %149 = arith.mulf %144, %146 : vector<8x32xf32>
    %150 = arith.addf %148, %149 : vector<8x32xf32>
    %151 = math.tanh %150 : vector<8x32xf32>
    %152 = arith.mulf %147, %151 : vector<8x32xf32>
    %c0_25 = arith.constant 0 : index
    %c0_26 = arith.constant 0 : index
    %153 = vector.load %arg4[%c0_25, %c0_26] : memref<32x8xf32, #tpu.memory_space<vmem>>, vector<32x8xf32>
    %cst_27 = arith.constant dense<0.000000e+00> : vector<8x8xf32>
    %154 = tpu.matmul %152, %153, %cst_27 {dimension_numbers = #tpu.dot_dimension_numbers<[1], [0], [0], [1], [0, 0, 1, 1], [], []>, precision = #tpu.contract_precision<fp32>} : vector<8x32xf32>, vector<32x8xf32>, vector<8x8xf32> -> vector<8x8xf32>
    %c0_28 = arith.constant 0 : index
    %c0_29 = arith.constant 0 : index
    %155 = vector.load %arg5[%c0_28, %c0_29] : memref<1x8xf32, #tpu.memory_space<vmem>>, vector<1x8xf32>
    %156 = vector.broadcast %155 : vector<1x8xf32> to vector<8x8xf32>
    %157 = arith.addf %154, %156 : vector<8x8xf32>
    %cst_30 = arith.constant dense<0xFF800000> : vector<8xf32>
    %158 = vector.multi_reduction <maximumf>, %157, %cst_30 [1] : vector<8x8xf32> to vector<8xf32>
    %159 = vector.shape_cast %158 : vector<8xf32> to vector<8x1xf32>
    %160 = vector.broadcast %159 : vector<8x1xf32> to vector<8x8xf32>
    %161 = arith.subf %157, %160 : vector<8x8xf32>
    %162 = math.exp %161 : vector<8x8xf32>
    %cst_31 = arith.constant dense<0.000000e+00> : vector<8xf32>
    %163 = vector.multi_reduction <add>, %162, %cst_31 [1] : vector<8x8xf32> to vector<8xf32>
    %164 = vector.shape_cast %163 : vector<8xf32> to vector<8x1xf32>
    %165 = math.log %164 : vector<8x1xf32>
    %166 = vector.broadcast %165 : vector<8x1xf32> to vector<8x8xf32>
    %167 = arith.subf %161, %166 : vector<8x8xf32>
    %c0_32 = arith.constant 0 : index
    %c0_33 = arith.constant 0 : index
    %168 = vector.load %arg6[%c0_32, %c0_33] : memref<8x8xf32, #tpu.memory_space<vmem>>, vector<8x8xf32>
    tpu.vector_store %arg6[%c0_32, %c0_33], %167 {strides = array<i32>} : memref<8x8xf32, #tpu.memory_space<vmem>>, vector<8x8xf32>,
    return
  }
}

</mosaic_0001>

<bundles_post_ra>
// kernel: tpu_custom_call.1
= control target key start
LH: loop header
LB: loop body
LE: loop exit
PB: predicated region body
PF: predicated region fallthrough
CT: control target
= control target key end

     0   :  { %vm41_vm0 = vcmask 130048   ;;  %s7821_s0 = inlined_call_operand.vmem [shape: f32[64,16], index: 0, kind: input, shape index: {}]   ;;  %s7822_s1 = inlined_call_operand.vmem [shape: f32[16,128], index: 1, kind: input, shape index: {}]   ;;  %s7823_s2 = inlined_call_operand.vmem [shape: f32[32,128], index: 2, kind: input, shape index: {}]   ;;  %s7824_s3 = inlined_call_operand.vmem [shape: f32[1,128], index: 3, kind: input, shape index: {}]   ;;  %s7825_s4 = inlined_call_operand.vmem [shape: f32[32,8], index: 4, kind: input, shape index: {}]   ;;  %s7826_s5 = inlined_call_operand.vmem [shape: f32[1,8], index: 5, kind: input, shape index: {}]   ;;  %s7827_s6 = inlined_call_operand.hbm [shape: f32[8,8], index: 6, kind: output, shape index: {}]  }
   0x1   :  { %v32_v0 = vld [vmem:[%s7822_s1] sm:$0xff]  ;;  %v33_v1 = vld [vmem:[%s7822_s1 + $0x8] sm:$0xff]  ;;  %v26_v7 = vld [vmem:[%s7821_s0 + $0x10] sm:$0xff] }
   0x2   :  { %v24_v2 = vld [vmem:[%s7821_s0] sm:$0xff]  ;;  %v67_v3 = vand.u32 4294901760, %v32_v0  ;;  %v70_v4 = vand.u32 4294901760, %v33_v1  ;;  %v25_v6 = vld [vmem:[%s7821_s0 + $0x8] sm:$0xff]  ;;  %v27_v8 = vld [vmem:[%s7821_s0 + $0x18] sm:$0xff]  ;;  %v49_v11 = vsel %vm41_vm0, %v26_v7, 0 }
   0x3   :  { %v43_v5 = vsel %vm41_vm0, %v24_v2, 0  ;;  %v46_v10 = vsel %vm41_vm0, %v25_v6, 0  ;;  %v52_v12 = vsel %vm41_vm0, %v27_v8, 0  ;;  %v28_v13 = vld [vmem:[%s7821_s0 + $0x20] sm:$0xff]  ;;  %v7174_v19 = vand.u32 4294901760, %v49_v11  ;;  %v29_v22 = vld [vmem:[%s7821_s0 + $0x28] sm:$0xff] }
   0x4   :  { %v7155_v9 = vand.u32 4294901760, %v43_v5  ;;  %v7163_v14 = vpack.c.bf16 %v70_v4, %v67_v3  ;;  %v7165_v15 = vand.u32 4294901760, %v46_v10  ;;  %v7167_v16 = vsub.f32 %v32_v0, %v67_v3 }
   0x5   :  { %v7169_v17 = vsub.f32 %v33_v1, %v70_v4  ;;  %v7177_v20 = vand.u32 4294901760, %v52_v12  ;;  %v55_v21 = vsel %vm41_vm0, %v28_v13, 0 }
   0x6   :  { %v7172_v18 = vsub.f32 %v43_v5, %v7155_v9  ;;  %5838 = vmatprep.mubr.f32.mxu0 %v7155_v9  ;;  %6509 = vmatprep.subr.bf16.mxu1 %v7163_v14  ;;  %v7185_v23 = vsub.f32 %v46_v10, %v7165_v15  ;;  %v216_v24 = vand.u32 4294901760, %v7167_v16 }
   0x7   :  { %v223_v25 = vand.u32 4294901760, %v7169_v17 }
   0x8   :  { %11 = vsyncpa [#allocation3], 0  ;;  %6511 = vmatpush3.bf16.msra.mxu1 %v7163_v14  ;;  %v135_v26 = vand.u32 4294901760, %v7172_v18  ;;  %v7192_v27 = vsub.f32 %v49_v11, %v7174_v19  ;;  %v7195_v28 = vsub.f32 %v52_v12, %v7177_v20  ;;  %v7197_v29 = vand.u32 4294901760, %v55_v21  ;;  %v30_v38 = vld [vmem:[%s7821_s0 + $0x30] sm:$0xff]  ;;  %v31_v47 = vld [vmem:[%s7821_s0 + $0x38] sm:$0xff] }
   0x9   :  { %v145_v30 = vand.u32 4294901760, %v7185_v23  ;;  %v217_v31 = vsub.f32 %v7167_v16, %v216_v24  ;;  %v224_v32 = vsub.f32 %v7169_v17, %v223_v25  ;;  %v58_v33 = vsel %vm41_vm0, %v29_v22, 0  ;;  %v826_v48 = vld [vmem:[%s7823_s2] sm:$0xff]  ;;  %v827_v53 = vld [vmem:[%s7823_s2 + $0x8] sm:$0xff]  ;;  %v828_v2 = vld [vmem:[%s7823_s2 + $0x10] sm:$0xff]  ;;  %s7099_s24 = smov 32  }
   0xa   :  { %v136_v34 = vsub.f32 %v7172_v18, %v135_v26  ;;  %v155_v35 = vand.u32 4294901760, %v7192_v27  ;;  %v165_v36 = vand.u32 4294901760, %v7195_v28  ;;  %v7213_v37 = vsub.f32 %v55_v21, %v7197_v29  ;;  %v829_v3 = vld [vmem:[%s7823_s2 + $0x18] sm:$0xff]  ;;  %s7100_s9 = smov [#allocation2]  }
   0xb   :  { %v146_v39 = vsub.f32 %v7185_v23, %v145_v30  ;;  %v218_v40 = vand.u32 4294901760, %v217_v31  ;;  %v225_v41 = vand.u32 4294901760, %v224_v32  ;;  %v7221_v42 = vand.u32 4294901760, %v58_v33 }
   0xc   :  { %v137_v43 = vand.u32 4294901760, %v136_v34  ;;  %v156_v44 = vsub.f32 %v7192_v27, %v155_v35  ;;  %v166_v45 = vsub.f32 %v7195_v28, %v165_v36  ;;  %v175_v46 = vand.u32 4294901760, %v7213_v37 }
   0xd   :  { %v147_v49 = vand.u32 4294901760, %v146_v39  ;;  %v6512_v50 = vpack.c.bf16 %v225_v41, %v218_v40  ;;  %v7237_v51 = vsub.f32 %v58_v33, %v7221_v42  ;;  %v61_v52 = vsel %vm41_vm0, %v30_v38, 0 }
   0xe   :  { %5822 = vmatprep.mubr.f32.mxu1 %v137_v43  ;;  %v157_v54 = vand.u32 4294901760, %v156_v44  ;;  %v6516_v55 = vpack.c.bf16 %v7169_v17, %v7167_v16  ;;  %v176_v56 = vsub.f32 %v7213_v37, %v175_v46  ;;  %v7248_v57 = vand.u32 4294901760, %v61_v52 }
   0xf   :  { %5823 = vmatmul.mubr.f32.vlgmr.msra.gmra.mrb[0].mxu1 %v147_v49  ;;  %6513 = vmatprep.subr.bf16.mxu0 %v6512_v50  ;;  %v167_v58 = vand.u32 4294901760, %v166_v45  ;;  %v185_v59 = vand.u32 4294901760, %v7237_v51  ;;  %v64_v60 = vsel %vm41_vm0, %v31_v47, 0  ;;  %v835_v61 = vand.u32 4294901760, %v826_v48 }
  0x10   :  { %6856 = vmatprep.subr.bf16.mxu1 %v6512_v50  ;;  %6515 = vmatpush3.bf16.msra.mxu0 %v6512_v50  ;;  %v177_v62 = vand.u32 4294901760, %v176_v56  ;;  %v7253_v63 = vsub.f32 %v61_v52, %v7248_v57  ;;  %v7255_v0 = vand.u32 4294901760, %v64_v60  ;;  %v838_v1 = vand.u32 4294901760, %v827_v53 }
  0x11   :  { %6857 = vmatpush3.bf16.msra.mxu1 %v6512_v50  ;;  %5825 = vmatprep.mubr.f32.mxu1 %v157_v54  ;;  %v186_v4 = vsub.f32 %v7237_v51, %v185_v59  ;;  %v7095_v7 = vmov 0.0|0.0   ;;  %v841_v10 = vand.u32 4294901760, %v828_v2  ;;  %v844_v11 = vand.u32 4294901760, %v829_v3 }
  0x12   :  { %6517 = vmatprep.subr.bf16.mxu0 %v6516_v55  ;;  %v195_v5 = vand.u32 4294901760, %v7253_v63  ;;  %v7268_v6 = vsub.f32 %v64_v60, %v7255_v0  ;;  %6532 = vmatprep.subr.bf16.mxu1 %v7095_v7  ;;  %v7276_v21 = vsub.f32 %v826_v48, %v835_v61  ;;  %v7278_v22 = vsub.f32 %v827_v53, %v838_v1 }
  0x13   :  { %5826 = vmatmul.mubr.f32.gmra.mrb[2].mxu1 %v167_v58  ;;  %5839 = vmatmul.mubr.f32.vlgmr.msra.gmra.mrb[0].mxu0 %v7165_v15  ;;  %v187_v8 = vand.u32 4294901760, %v186_v4  ;;  %v7286_v33 = vsub.f32 %v828_v2, %v841_v10  ;;  %v7291_v40 = vsub.f32 %v829_v3, %v844_v11  ;;  %v6524_v41 = vpack.c.bf16 %v223_v25, %v216_v24 }
  0x14   :  { %6519 = vmatpush3.bf16.msra.mxu0 %v6516_v55  ;;  %5828 = vmatprep.mubr.f32.mxu1 %v177_v62  ;;  %v196_v12 = vsub.f32 %v7253_v63, %v195_v5  ;;  %v205_v13 = vand.u32 4294901760, %v7268_v6  ;;  %v916_v38 = vand.u32 4294901760, %v7276_v21  ;;  %v923_v39 = vand.u32 4294901760, %v7278_v22 }
  0x15   :  { %5841 = vmatprep.mubr.f32.mxu0 %v7174_v19  ;;  %6521 = vmatprep.subr.bf16.mxu0 %v7163_v14  ;;  %v7298_v43 = vpack.c.bf16 %v838_v1, %v835_v61  ;;  %v930_v17 = vand.u32 4294901760, %v7286_v33  ;;  %v937_v24 = vand.u32 4294901760, %v7291_v40  ;;  %v7313_v25 = vpack.c.bf16 %v844_v11, %v841_v10 }
  0x16   :  { %v197_v31 = vand.u32 4294901760, %v196_v12  ;;  %v206_v32 = vsub.f32 %v7268_v6, %v205_v13  ;;  %v917_v44 = vsub.f32 %v7276_v21, %v916_v38  ;;  %v924_v16 = vsub.f32 %v7278_v22, %v923_v39 }
  0x17   :  { %5829 = vmatmul.mubr.f32.gmra.mrb[4].mxu1 %v187_v8  ;;  %5842 = vmatmul.mubr.f32.gmra.mrb[2].mxu0 %v7177_v20  ;;  %v931_v48 = vsub.f32 %v7286_v33, %v930_v17  ;;  %v938_v49 = vsub.f32 %v7291_v40, %v937_v24  ;;  %vm7096_vm1 = vmmov 0   ;;  %v7097_v54 = vmov 0.0  }
  0x18   :  { %5831 = vmatprep.mubr.f32.mxu1 %v197_v31  ;;  %5854 = vmatprep.mubr.f32.mxu0 %v7172_v18  ;;  %v207_v34 = vand.u32 4294901760, %v206_v32  ;;  %v918_v45 = vand.u32 4294901760, %v917_v44  ;;  %v925_v47 = vand.u32 4294901760, %v924_v16  ;;  %v7349_v56 = vpack.c.bf16 %v7278_v22, %v7276_v21 }
  0x19   :  { %v932_v52 = vand.u32 4294901760, %v931_v48  ;;  %v939_v53 = vand.u32 4294901760, %v938_v49  ;;  %v7363_v18 = vpack.c.bf16 %v7291_v40, %v7286_v33  ;;  %vm830_vm2 = vcmask 261120  }
  0x1a   :  { %v7329_v50 = vpack.c.bf16 %v925_v47, %v918_v45  ;;  %vm5450_vm3 = vcmask 64512  }
  0x1b   :  { %5832 = vmatmul.mubr.f32.gmra.mrb[6].mxu1 %v207_v34  ;;  %5855 = vmatmul.mubr.f32.vlgmr.msra.gmra.mrb[0].mxu0 %v7185_v23  ;;  %v7339_v55 = vpack.c.bf16 %v939_v53, %v932_v52  ;;  %v7389_v23 = vpack.c.bf16 %v923_v39, %v916_v38 }
  0x1c   :  { %6523 = vmatpush3.bf16.msra.mxu0 %v7163_v14  ;;  %5844 = vmatprep.mubr.f32.mxu1 %v7197_v29 }
  0x1d   :  { %5857 = vmatprep.mubr.f32.mxu0 %v7192_v27  ;;  %6525 = vmatprep.subr.bf16.mxu0 %v6524_v41 }
  0x1f   :  { %5845 = vmatmul.mubr.f32.vlgmr.msra.gmra.mrb[4].mxu1 %v7221_v42  ;;  %5858 = vmatmul.mubr.f32.gmra.mrb[2].mxu0 %v7195_v28 }
  0x20   :  { %6534 = vmatpush3.bf16.msra.mxu1 %v7298_v43  ;;  %5847 = vmatprep.mubr.f32.mxu1 %v7248_v57 }
  0x21   :  { %5860 = vmatprep.mubr.f32.mxu0 %v7213_v37  ;;  %6535 = vmatprep.subr.bf16.mxu1 %v7095_v7 }
  0x23   :  { %5848 = vmatmul.mubr.f32.gmra.mrb[6].mxu1 %v7255_v0  ;;  %5861 = vmatmul.mubr.f32.gmra.mrb[4].mxu0 %v7237_v51 }
  0x24   :  { %6537 = vmatpush3.bf16.msra.mxu1 %v7313_v25  ;;  %5863 = vmatprep.mubr.f32.mxu0 %v7253_v63 }
  0x25   :  { %5922 = vmatprep.mubr.msk.f32.mxu1 %vm7096_vm1, %v7097_v54  ;;  %6538 = vmatprep.subr.bf16.mxu1 %v7095_v7 }
  0x27   :  { %5864 = vmatmul.mubr.f32.gmra.mrb[6].mxu0 %v7268_v6  ;;  %5923 = vmatmul.mubr.f32.vlgmr.msra.gmra.mrb[8].mxu1 %v7097_v54 }
  0x28   :  { %6540 = vmatpush3.bf16.msra.mxu1 %v7329_v50  ;;  %5870 = vmatprep.mubr.f32.mxu0 %v135_v26 }
  0x29   :  { %6541 = vmatprep.subr.bf16.mxu1 %v7095_v7  ;;  %5933 = vmatprep.mubr.msk.f32.mxu1 %vm7096_vm1, %v7097_v54 }
  0x2b   :  { %5871 = vmatmul.mubr.f32.vlgmr.msra.gmra.mrb[0].mxu0 %v145_v30 }
  0x2c   :  { %6543 = vmatpush3.bf16.msra.mxu1 %v7339_v55  ;;  %6527 = vmatpush3.bf16.msra.mxu0 %v6524_v41 }
  0x2d   :  { %5873 = vmatprep.mubr.f32.mxu0 %v155_v35  ;;  %6544 = vmatprep.subr.bf16.mxu1 %v7095_v7 }
  0x2e   :  { %6529 = vmatprep.subr.bf16.mxu0 %v7163_v14 }
  0x2f   :  { %5874 = vmatmul.mubr.f32.gmra.mrb[2].mxu0 %v165_v36  ;;  %5934 = vmatmul.mubr.f32.vlgmr.msra.gmra.mrb[8].mxu1 %v7097_v54 }
  0x30   :  { %6546 = vmatpush3.bf16.msra.mxu1 %v7349_v56  ;;  %5876 = vmatprep.mubr.f32.mxu0 %v175_v46 }
  0x31   :  { %6547 = vmatprep.subr.bf16.mxu1 %v7095_v7  ;;  %5944 = vmatprep.mubr.msk.f32.mxu1 %vm7096_vm1, %v7097_v54 }
  0x33   :  { %5877 = vmatmul.mubr.f32.gmra.mrb[4].mxu0 %v185_v59 }
  0x34   :  { %6549 = vmatpush3.bf16.msra.mxu1 %v7363_v18  ;;  %5879 = vmatprep.mubr.f32.mxu0 %v195_v5 }
  0x35   :  { %6550 = vmatprep.subr.bf16.mxu1 %v7095_v7 }
  0x37   :  { %5880 = vmatmul.mubr.f32.gmra.mrb[6].mxu0 %v205_v13  ;;  %5945 = vmatmul.mubr.f32.vlgmr.msra.gmra.mrb[8].mxu1 %v7097_v54 }
  0x38   :  { %6552 = vmatpush3.bf16.msra.mxu1 %v7298_v43  ;;  %5886 = vmatprep.mubr.f32.mxu0 %v7155_v9 }
  0x39   :  { %6553 = vmatprep.subr.bf16.mxu1 %v7095_v7  ;;  %5955 = vmatprep.mubr.msk.f32.mxu1 %vm7096_vm1, %v7097_v54 }
  0x3b   :  { %5887 = vmatmul.mubr.f32.vlgmr.msra.gmra.mrb[0].mxu0 %v7165_v15 }
  0x3c   :  { %6555 = vmatpush3.bf16.msra.mxu1 %v7313_v25  ;;  %6531 = vmatpush3.bf16.msra.mxu0 %v7163_v14  ;;  %v7402_v14 = vpack.c.bf16 %v937_v24, %v930_v17 }
  0x3d   :  { %5889 = vmatprep.mubr.f32.mxu0 %v7174_v19  ;;  %6556 = vmatprep.subr.bf16.mxu1 %v7095_v7 }
  0x3e   :  { %6604 = vmatprep.subr.bf16.mxu0 %v7095_v7 }
  0x3f   :  { %5890 = vmatmul.mubr.f32.gmra.mrb[2].mxu0 %v7177_v20  ;;  %5956 = vmatmul.mubr.f32.vlgmr.msra.gmra.mrb[8].mxu1 %v7097_v54 }
  0x40   :  { %6558 = vmatpush3.bf16.msra.mxu1 %v7389_v23  ;;  %5892 = vmatprep.mubr.f32.mxu0 %v7197_v29 }
  0x41   :  { %6559 = vmatprep.subr.bf16.mxu1 %v7095_v7  ;;  %5966 = vmatprep.mubr.msk.f32.mxu1 %vm7096_vm1, %v7097_v54 }
  0x43   :  { %5893 = vmatmul.mubr.f32.gmra.mrb[4].mxu0 %v7221_v42 }
  0x44   :  { %6561 = vmatpush3.bf16.msra.mxu1 %v7402_v14  ;;  %5895 = vmatprep.mubr.f32.mxu0 %v7248_v57 }
  0x45   :  { %6562 = vmatprep.subr.bf16.mxu1 %v7095_v7 }
  0x47   :  { %5896 = vmatmul.mubr.f32.gmra.mrb[6].mxu0 %v7255_v0  ;;  %5967 = vmatmul.mubr.f32.vlgmr.msra.gmra.mrb[8].mxu1 %v7097_v54 }
  0x48   :  { %6564 = vmatpush3.bf16.msra.mxu1 %v7298_v43  ;;  %5902 = vmatprep.mubr.f32.mxu0 %v7155_v9  ;;  %v5478_v9 = vld [vmem:[%s7824_s3] ss:$0 sm:$0xff]  ;;  %s7098_s3 = smov 64  }
  0x49   :  { %6565 = vmatprep.subr.bf16.mxu1 %v7095_v7  ;;  %5977 = vmatprep.mubr.msk.f32.mxu1 %vm7096_vm1, %v7097_v54 }
  0x4b   :  { %5903 = vmatmul.mubr.f32.vlgmr.msra.gmra.mrb[0].mxu0 %v7165_v15 }
  0x4c   :  { %6567 = vmatpush3.bf16.msra.mxu1 %v7313_v25  ;;  %5905 = vmatprep.mubr.f32.mxu0 %v7174_v19 }
  0x4d   :  { %6568 = vmatprep.subr.bf16.mxu1 %v7095_v7  ;;  %6606 = vmatpush3.bf16.msra.mxu0 %v7298_v43 }
  0x4e   :  { %6607 = vmatprep.subr.bf16.mxu0 %v7095_v7 }
  0x4f   :  { %5906 = vmatmul.mubr.f32.gmra.mrb[2].mxu0 %v7177_v20  ;;  %5978 = vmatmul.mubr.f32.vlgmr.msra.gmra.mrb[8].mxu1 %v7097_v54 }
  0x50   :  { %5908 = vmatprep.mubr.f32.mxu0 %v7197_v29  ;;  %6570 = vmatpush3.bf16.msra.mxu1 %v7298_v43 }
  0x51   :  { %6571 = vmatprep.subr.bf16.mxu1 %v7095_v7  ;;  %5988 = vmatprep.mubr.msk.f32.mxu1 %vm7096_vm1, %v7097_v54 }
  0x52   :  { %6609 = vmatpush3.bf16.msra.mxu0 %v7313_v25 }
  0x53   :  { %5909 = vmatmul.mubr.f32.gmra.mrb[4].mxu0 %v7221_v42  ;;  %6610 = vmatprep.subr.bf16.mxu0 %v7095_v7 }
  0x54   :  { %5911 = vmatprep.mubr.f32.mxu0 %v7248_v57  ;;  %6573 = vmatpush3.bf16.msra.mxu1 %v7313_v25 }
  0x55   :  { %6574 = vmatprep.subr.bf16.mxu1 %v7095_v7 }
  0x57   :  { %5912 = vmatmul.mubr.f32.gmra.mrb[6].mxu0 %v7255_v0 }
  0x58   :  { %6054 = vmatprep.mubr.msk.f32.mxu0 %vm7096_vm1, %v7097_v54 }
  0xe2   :  { %v5824_v15 = vpop.f32.mrb[0].mxu1 }
  0xe3   :  { %v150_v19 = vadd.f32 %v5824_v15, %v5478_v9  ;;  %v139_v20 = vpop.f32.mrb[1].mxu1 }
  0xe4   :  { %v140_v58 = vadd.f32 %v5478_v9, %v139_v20 }
  0xe6   :  { %v5827_v26 = vpop.f32.mrb[2].mxu1 }
  0xe7   :  { %v170_v27 = vadd.f32 %v5827_v26, %v5478_v9  ;;  %v159_v28 = vpop.f32.mrb[3].mxu1 }
  0xe8   :  { %v160_v29 = vadd.f32 %v5478_v9, %v159_v28 }
  0xf2   :  { %v5846_v30 = vpop.f32.mrb[4].mxu1 }
  0xf3   :  { %v6866_v35 = vadd.f32 %v5846_v30, %v5478_v9  ;;  %v314_v36 = vpop.f32.mrb[5].mxu1 }
  0xf4   :  { %v6868_v37 = vadd.f32 %v5478_v9, %v314_v36 }
  0xf6   :  { %v5849_v42 = vpop.f32.mrb[6].mxu1 }
  0xf7   :  { %v6870_v46 = vadd.f32 %v5849_v42, %v5478_v9  ;;  %v326_v51 = vpop.f32.mrb[7].mxu1 }
  0xf8   :  { %v6872_v57 = vadd.f32 %v5478_v9, %v326_v51 }
 0x11e   :  { %v5904_v59 = vpop.f32.mrb[0].mxu0 }
 0x11f   :  { %v7443_v60 = vadd.f32 %v5904_v59, %v150_v19  ;;  %v780_v61 = vpop.f32.mrb[1].mxu0 }
 0x120   :  { %v6861_v62 = vadd.f32 %v780_v61, %v140_v58 }
 0x122   :  { %v5907_v63 = vpop.f32.mrb[2].mxu0  ;;  %v1315_v0 = vpop.f32.mrb[8].mxu1 }
 0x123   :  { %v7445_v1 = vadd.f32 %v5907_v63, %v170_v27  ;;  %v1319_v2 = vadd.f32 %v6861_v62, %v1315_v0  ;;  %v792_v3 = vpop.f32.mrb[3].mxu0  ;;  %v5979_v4 = vpop.f32.mrb[9].mxu1 }
 0x124   :  { %v7447_v5 = vadd.f32 %v792_v3, %v160_v29 }
 0x125   :  { %7003 = vtanh.f32 %v1319_v2  ;;  %v5479_v32 = vmul.f32 -1.442695, %v1319_v2 }
 0x126   :  { %v5910_v6 = vpop.f32.mrb[4].mxu0 }
 0x127   :  { %v7449_v8 = vadd.f32 %v6866_v35, %v5910_v6  ;;  %v804_v10 = vpop.f32.mrb[5].mxu0  ;;  %7005 = vpow2.f32 %v5479_v32 }
 0x128   :  { %v7451_v11 = vadd.f32 %v6868_v37, %v804_v10 }
 0x12a   :  { %v5913_v12 = vpop.f32.mrb[6].mxu0 }
 0x12b   :  { %v7453_v13 = vadd.f32 %v6870_v46, %v5913_v12  ;;  %v816_v21 = vpop.f32.mrb[7].mxu0 }
 0x12c   :  { %v7455_v22 = vadd.f32 %v6872_v57, %v816_v21 }
 0x12f   :  { %v7004_v31 = vpop.eup %7003 }
 0x130   :  { %1329 = vrot.lane.b32.xlu0 %v7004_v31, %s7098_s3 }
 0x131   :  { %v7006_v33 = vpop.eup %7005 }
 0x132   :  { %v1323_v34 = vadd.f32 1.0, %v7006_v33 }
 0x134   :  { %7007 = vrcp.f32 %v1323_v34 }
 0x13e   :  { %v7008_v38 = vpop.eup %7007 }
 0x13f   :  { %v1327_v41 = vmul.f32 0.0, %v7008_v38 }
 0x1a2   :  { %v1330_v39 = vpop.permute.xlu0 %1329 }
 0x1a3   :  { %v1332_v40 = vmul.f32 %v7008_v38, %v1330_v39 }
 0x1a5   :  { %1334 = vrot.lane.b32.xlu0 %v1332_v40, %s7099_s24 }
 0x217   :  { %v1335_v44 = vpop.permute.xlu0 %1334 }
 0x218   :  { %v7459_v16 = vadd.f32 %v1335_v44, %v1327_v41 }
 0x21a   :  { %7009 = vtanh.f32 %v7459_v16 }
 0x224   :  { %v7010_v17 = vpop.eup %7009 }
 0x225   :  { %1340 = vrot.lane.b32.xlu1 %v7010_v17, %s7098_s3 }
 0x297   :  { %v1341_v24 = vpop.permute.xlu1 %1340 }
 0x298   :  { %v1343_v45 = vmul.f32 %v7008_v38, %v1341_v24 }
 0x29a   :  { %1345 = vrot.lane.b32.xlu1 %v1343_v45, %s7099_s24 }
 0x30c   :  { %v1346_v47 = vpop.permute.xlu1 %1345 }
 0x30d   :  { %v1347_v48 = vsel %vm830_vm2, %v1346_v47, 0 }
 0x30e   :  { %v1418_v49 = vand.u32 4294901760, %v1347_v48 }
 0x310   :  { %v1419_v52 = vsub.f32 %v1347_v48, %v1418_v49 }
 0x312   :  { %v1420_v53 = vand.u32 4294901760, %v1419_v52 }
 0x314   :  { %v1421_v9 = vsub.f32 %v1419_v52, %v1420_v53 }
 0x316   :  { %v1422_v15 = vand.u32 4294901760, %v1421_v9 }
 0x318   :  { %5989 = vmatmul.mubr.f32.vlgmr.msra.gmra.mrb[10].mxu1 %v1422_v15 }
 0x319   :  { %6576 = vmatpush3.bf16.msra.mxu1 %v7329_v50  ;;  %5999 = vmatprep.mubr.msk.f32.mxu1 %vm7096_vm1, %v7097_v54 }
 0x31a   :  { %6577 = vmatprep.subr.bf16.mxu1 %v7095_v7 }
 0x31d   :  { %6579 = vmatpush3.bf16.msra.mxu1 %v7339_v55 }
 0x31e   :  { %6580 = vmatprep.subr.bf16.mxu1 %v7095_v7 }
 0x320   :  { %6000 = vmatmul.mubr.f32.vlgmr.msra.gmra.mrb[10].mxu1 %v1418_v49 }
 0x321   :  { %6582 = vmatpush3.bf16.msra.mxu1 %v7349_v56  ;;  %6010 = vmatprep.mubr.msk.f32.mxu1 %vm7096_vm1, %v7097_v54 }
 0x322   :  { %6583 = vmatprep.subr.bf16.mxu1 %v7095_v7 }
 0x325   :  { %6585 = vmatpush3.bf16.msra.mxu1 %v7363_v18 }
 0x326   :  { %6586 = vmatprep.subr.bf16.mxu1 %v7095_v7 }
 0x328   :  { %6011 = vmatmul.mubr.f32.vlgmr.msra.gmra.mrb[10].mxu1 %v1419_v52 }
 0x329   :  { %6588 = vmatpush3.bf16.msra.mxu1 %v7298_v43  ;;  %6021 = vmatprep.mubr.msk.f32.mxu1 %vm7096_vm1, %v7097_v54 }
 0x32a   :  { %6589 = vmatprep.subr.bf16.mxu1 %v7095_v7 }
 0x32d   :  { %6591 = vmatpush3.bf16.msra.mxu1 %v7313_v25 }
 0x32e   :  { %6592 = vmatprep.subr.bf16.mxu1 %v7095_v7 }
 0x330   :  { %6022 = vmatmul.mubr.f32.vlgmr.msra.gmra.mrb[10].mxu1 %v1420_v53 }
 0x331   :  { %6594 = vmatpush3.bf16.msra.mxu1 %v7389_v23  ;;  %6032 = vmatprep.mubr.msk.f32.mxu1 %vm7096_vm1, %v7097_v54 }
 0x332   :  { %6595 = vmatprep.subr.bf16.mxu1 %v7095_v7 }
 0x335   :  { %6597 = vmatpush3.bf16.msra.mxu1 %v7402_v14 }
 0x336   :  { %6598 = vmatprep.subr.bf16.mxu1 %v7095_v7 }
 0x338   :  { %6033 = vmatmul.mubr.f32.vlgmr.msra.gmra.mrb[10].mxu1 %v1418_v49 }
 0x339   :  { %6600 = vmatpush3.bf16.msra.mxu1 %v7298_v43  ;;  %6043 = vmatprep.mubr.msk.f32.mxu1 %vm7096_vm1, %v7097_v54 }
 0x33a   :  { %6601 = vmatprep.subr.bf16.mxu1 %v7095_v7 }
 0x33d   :  { %6603 = vmatpush3.bf16.msra.mxu1 %v7313_v25 }
 0x33e   :  { %6640 = vmatprep.subr.bf16.mxu1 %v7095_v7 }
 0x340   :  { %6044 = vmatmul.mubr.f32.vlgmr.msra.gmra.mrb[10].mxu1 %v1418_v49 }
 0x341   :  { %6642 = vmatpush3.bf16.msra.mxu1 %v7298_v43  ;;  %6120 = vmatprep.mubr.msk.f32.mxu1 %vm7096_vm1, %v7097_v54 }
 0x342   :  { %6643 = vmatprep.subr.bf16.mxu1 %v7095_v7 }
 0x345   :  { %6645 = vmatpush3.bf16.msra.mxu1 %v7313_v25 }
 0x346   :  { %6646 = vmatprep.subr.bf16.mxu1 %v7095_v7 }
 0x413   :  { %v1830_v19 = vpop.f32.mrb[10].mxu1 }
 0x414   :  { %v1834_v20 = vadd.f32 %v7443_v60, %v1830_v19  ;;  %v6045_v26 = vpop.f32.mrb[11].mxu1 }
 0x416   :  { %7011 = vtanh.f32 %v1834_v20  ;;  %v5480_v28 = vmul.f32 -1.442695, %v1834_v20 }
 0x418   :  { %7013 = vpow2.f32 %v5480_v28 }
 0x420   :  { %v7012_v27 = vpop.eup %7011 }
 0x421   :  { %1844 = vrot.lane.b32.xlu0 %v7012_v27, %s7098_s3 }
 0x422   :  { %v7014_v29 = vpop.eup %7013 }
 0x423   :  { %v1838_v30 = vadd.f32 1.0, %v7014_v29 }
 0x425   :  { %7015 = vrcp.f32 %v1838_v30 }
 0x42f   :  { %v7016_v35 = vpop.eup %7015 }
 0x430   :  { %v1842_v42 = vmul.f32 %v7016_v35, %v7459_v16 }
 0x493   :  { %v1845_v36 = vpop.permute.xlu0 %1844 }
 0x494   :  { %v1847_v37 = vmul.f32 %v7016_v35, %v1845_v36 }
 0x496   :  { %1849 = vrot.lane.b32.xlu1 %v1847_v37, %s7099_s24 }
 0x508   :  { %v1850_v46 = vpop.permute.xlu1 %1849 }
 0x509   :  { %v7505_v51 = vadd.f32 %v1850_v46, %v1842_v42 }
 0x50b   :  { %7017 = vtanh.f32 %v7505_v51 }
 0x515   :  { %v7018_v57 = vpop.eup %7017 }
 0x516   :  { %1855 = vrot.lane.b32.xlu0 %v7018_v57, %s7098_s3 }
 0x588   :  { %v1856_v58 = vpop.permute.xlu0 %1855 }
 0x589   :  { %v1858_v59 = vmul.f32 %v7016_v35, %v1856_v58 }
 0x58b   :  { %1860 = vrot.lane.b32.xlu1 %v1858_v59, %s7099_s24 }
 0x5fd   :  { %v1861_v60 = vpop.permute.xlu1 %1860 }
 0x5fe   :  { %v1862_v61 = vsel %vm830_vm2, %v1861_v60, 0 }
 0x5ff   :  { %v1933_v62 = vand.u32 4294901760, %v1862_v61 }
 0x601   :  { %v1934_v63 = vsub.f32 %v1862_v61, %v1933_v62 }
 0x603   :  { %v1935_v0 = vand.u32 4294901760, %v1934_v63 }
 0x605   :  { %v1936_v2 = vsub.f32 %v1934_v63, %v1935_v0 }
 0x607   :  { %v1937_v3 = vand.u32 4294901760, %v1936_v2 }
 0x609   :  { %6055 = vmatmul.mubr.f32.vlgmr.msra.gmra.mrb[8].mxu0 %v1937_v3 }
 0x60a   :  { %6612 = vmatpush3.bf16.msra.mxu0 %v7329_v50  ;;  %6065 = vmatprep.mubr.msk.f32.mxu0 %vm7096_vm1, %v7097_v54 }
 0x60b   :  { %6613 = vmatprep.subr.bf16.mxu0 %v7095_v7 }
 0x60e   :  { %6615 = vmatpush3.bf16.msra.mxu0 %v7339_v55 }
 0x60f   :  { %6616 = vmatprep.subr.bf16.mxu0 %v7095_v7 }
 0x611   :  { %6066 = vmatmul.mubr.f32.vlgmr.msra.gmra.mrb[8].mxu0 %v1933_v62 }
 0x612   :  { %6618 = vmatpush3.bf16.msra.mxu0 %v7349_v56  ;;  %6076 = vmatprep.mubr.msk.f32.mxu0 %vm7096_vm1, %v7097_v54 }
 0x613   :  { %6619 = vmatprep.subr.bf16.mxu0 %v7095_v7 }
 0x616   :  { %6621 = vmatpush3.bf16.msra.mxu0 %v7363_v18 }
 0x617   :  { %6622 = vmatprep.subr.bf16.mxu0 %v7095_v7 }
 0x619   :  { %6077 = vmatmul.mubr.f32.vlgmr.msra.gmra.mrb[8].mxu0 %v1934_v63 }
 0x61a   :  { %6624 = vmatpush3.bf16.msra.mxu0 %v7298_v43  ;;  %6087 = vmatprep.mubr.msk.f32.mxu0 %vm7096_vm1, %v7097_v54 }
 0x61b   :  { %6625 = vmatprep.subr.bf16.mxu0 %v7095_v7 }
 0x61e   :  { %6627 = vmatpush3.bf16.msra.mxu0 %v7313_v25 }
 0x61f   :  { %6628 = vmatprep.subr.bf16.mxu0 %v7095_v7 }
 0x621   :  { %6088 = vmatmul.mubr.f32.vlgmr.msra.gmra.mrb[8].mxu0 %v1935_v0 }
 0x622   :  { %6630 = vmatpush3.bf16.msra.mxu0 %v7389_v23  ;;  %6098 = vmatprep.mubr.msk.f32.mxu0 %vm7096_vm1, %v7097_v54 }
 0x623   :  { %6631 = vmatprep.subr.bf16.mxu0 %v7095_v7 }
 0x626   :  { %6633 = vmatpush3.bf16.msra.mxu0 %v7402_v14 }
 0x627   :  { %6634 = vmatprep.subr.bf16.mxu0 %v7095_v7 }
 0x629   :  { %6099 = vmatmul.mubr.f32.vlgmr.msra.gmra.mrb[8].mxu0 %v1933_v62 }
 0x62a   :  { %6636 = vmatpush3.bf16.msra.mxu0 %v7298_v43  ;;  %6109 = vmatprep.mubr.msk.f32.mxu0 %vm7096_vm1, %v7097_v54 }
 0x62b   :  { %6637 = vmatprep.subr.bf16.mxu0 %v7095_v7 }
 0x62e   :  { %6639 = vmatpush3.bf16.msra.mxu0 %v7313_v25 }
 0x62f   :  { %6676 = vmatprep.subr.bf16.mxu0 %v7095_v7 }
 0x631   :  { %6110 = vmatmul.mubr.f32.vlgmr.msra.gmra.mrb[8].mxu0 %v1933_v62 }
 0x632   :  { %6678 = vmatpush3.bf16.msra.mxu0 %v7298_v43  ;;  %6186 = vmatprep.mubr.msk.f32.mxu0 %vm7096_vm1, %v7097_v54 }
 0x633   :  { %6679 = vmatprep.subr.bf16.mxu0 %v7095_v7 }
 0x636   :  { %6681 = vmatpush3.bf16.msra.mxu0 %v7313_v25 }
 0x637   :  { %6682 = vmatprep.subr.bf16.mxu0 %v7095_v7 }
 0x704   :  { %v2345_v4 = vpop.f32.mrb[8].mxu0 }
 0x705   :  { %v2349_v6 = vadd.f32 %v7447_v5, %v2345_v4  ;;  %v6111_v10 = vpop.f32.mrb[9].mxu0 }
 0x707   :  { %7019 = vtanh.f32 %v2349_v6  ;;  %v5481_v21 = vmul.f32 -1.442695, %v2349_v6 }
 0x709   :  { %7021 = vpow2.f32 %v5481_v21 }
 0x711   :  { %v7020_v12 = vpop.eup %7019 }
 0x712   :  { %2359 = vrot.lane.b32.xlu0 %v7020_v12, %s7098_s3 }
 0x713   :  { %v7022_v31 = vpop.eup %7021 }
 0x714   :  { %v2353_v32 = vadd.f32 1.0, %v7022_v31 }
 0x716   :  { %7023 = vrcp.f32 %v2353_v32 }
 0x720   :  { %v7024_v33 = vpop.eup %7023 }
 0x721   :  { %v2357_v39 = vmul.f32 %v7024_v33, %v7505_v51 }
 0x784   :  { %v2360_v34 = vpop.permute.xlu0 %2359 }
 0x785   :  { %v2362_v38 = vmul.f32 %v7024_v33, %v2360_v34 }
 0x787   :  { %2364 = vrot.lane.b32.xlu1 %v2362_v38, %s7099_s24 }
 0x7f9   :  { %v2365_v40 = vpop.permute.xlu1 %2364 }
 0x7fa   :  { %v7551_v41 = vadd.f32 %v2365_v40, %v2357_v39 }
 0x7fc   :  { %7025 = vtanh.f32 %v7551_v41 }
 0x806   :  { %v7026_v5 = vpop.eup %7025 }
 0x807   :  { %2370 = vrot.lane.b32.xlu0 %v7026_v5, %s7098_s3 }
 0x879   :  { %v2371_v44 = vpop.permute.xlu0 %2370 }
 0x87a   :  { %v2373_v16 = vmul.f32 %v7024_v33, %v2371_v44 }
 0x87c   :  { %2375 = vrot.lane.b32.xlu1 %v2373_v16, %s7099_s24 }
 0x8ee   :  { %v2376_v17 = vpop.permute.xlu1 %2375 }
 0x8ef   :  { %v2377_v24 = vsel %vm830_vm2, %v2376_v17, 0 }
 0x8f0   :  { %v2448_v45 = vand.u32 4294901760, %v2377_v24 }
 0x8f2   :  { %v2449_v47 = vsub.f32 %v2377_v24, %v2448_v45 }
 0x8f4   :  { %v2450_v48 = vand.u32 4294901760, %v2449_v47 }
 0x8f6   :  { %v2451_v49 = vsub.f32 %v2449_v47, %v2450_v48 }
 0x8f8   :  { %v2452_v52 = vand.u32 4294901760, %v2451_v49 }
 0x8fa   :  { %6121 = vmatmul.mubr.f32.vlgmr.msra.gmra.mrb[12].mxu1 %v2452_v52 }
 0x8fb   :  { %6648 = vmatpush3.bf16.msra.mxu1 %v7329_v50  ;;  %6131 = vmatprep.mubr.msk.f32.mxu1 %vm7096_vm1, %v7097_v54 }
 0x8fc   :  { %6649 = vmatprep.subr.bf16.mxu1 %v7095_v7 }
 0x8ff   :  { %6651 = vmatpush3.bf16.msra.mxu1 %v7339_v55 }
 0x900   :  { %6652 = vmatprep.subr.bf16.mxu1 %v7095_v7 }
 0x902   :  { %6132 = vmatmul.mubr.f32.vlgmr.msra.gmra.mrb[12].mxu1 %v2448_v45 }
 0x903   :  { %6654 = vmatpush3.bf16.msra.mxu1 %v7349_v56  ;;  %6142 = vmatprep.mubr.msk.f32.mxu1 %vm7096_vm1, %v7097_v54 }
 0x904   :  { %6655 = vmatprep.subr.bf16.mxu1 %v7095_v7 }
 0x907   :  { %6657 = vmatpush3.bf16.msra.mxu1 %v7363_v18 }
 0x908   :  { %6658 = vmatprep.subr.bf16.mxu1 %v7095_v7 }
 0x90a   :  { %6143 = vmatmul.mubr.f32.vlgmr.msra.gmra.mrb[12].mxu1 %v2449_v47 }
 0x90b   :  { %6660 = vmatpush3.bf16.msra.mxu1 %v7298_v43  ;;  %6153 = vmatprep.mubr.msk.f32.mxu1 %vm7096_vm1, %v7097_v54 }
 0x90c   :  { %6661 = vmatprep.subr.bf16.mxu1 %v7095_v7 }
 0x90f   :  { %6663 = vmatpush3.bf16.msra.mxu1 %v7313_v25 }
 0x910   :  { %6664 = vmatprep.subr.bf16.mxu1 %v7095_v7 }
 0x912   :  { %6154 = vmatmul.mubr.f32.vlgmr.msra.gmra.mrb[12].mxu1 %v2450_v48 }
 0x913   :  { %6666 = vmatpush3.bf16.msra.mxu1 %v7389_v23  ;;  %6164 = vmatprep.mubr.msk.f32.mxu1 %vm7096_vm1, %v7097_v54 }
 0x914   :  { %6667 = vmatprep.subr.bf16.mxu1 %v7095_v7 }
 0x917   :  { %6669 = vmatpush3.bf16.msra.mxu1 %v7402_v14 }
 0x918   :  { %6670 = vmatprep.subr.bf16.mxu1 %v7095_v7 }
 0x91a   :  { %6165 = vmatmul.mubr.f32.vlgmr.msra.gmra.mrb[12].mxu1 %v2448_v45 }
 0x91b   :  { %6672 = vmatpush3.bf16.msra.mxu1 %v7298_v43  ;;  %6175 = vmatprep.mubr.msk.f32.mxu1 %vm7096_vm1, %v7097_v54 }
 0x91c   :  { %6673 = vmatprep.subr.bf16.mxu1 %v7095_v7 }
 0x91f   :  { %6675 = vmatpush3.bf16.msra.mxu1 %v7313_v25 }
 0x920   :  { %6712 = vmatprep.subr.bf16.mxu1 %v7095_v7 }
 0x922   :  { %6176 = vmatmul.mubr.f32.vlgmr.msra.gmra.mrb[12].mxu1 %v2448_v45 }
 0x923   :  { %6714 = vmatpush3.bf16.msra.mxu1 %v7298_v43  ;;  %6252 = vmatprep.mubr.msk.f32.mxu1 %vm7096_vm1, %v7097_v54 }
 0x924   :  { %6715 = vmatprep.subr.bf16.mxu1 %v7095_v7 }
 0x927   :  { %6717 = vmatpush3.bf16.msra.mxu1 %v7313_v25 }
 0x928   :  { %6718 = vmatprep.subr.bf16.mxu1 %v7095_v7 }
 0x9f5   :  { %v2860_v53 = vpop.f32.mrb[12].mxu1 }
 0x9f6   :  { %v2864_v9 = vadd.f32 %v7445_v1, %v2860_v53  ;;  %v6177_v15 = vpop.f32.mrb[13].mxu1 }
 0x9f8   :  { %7027 = vtanh.f32 %v2864_v9  ;;  %v5482_v20 = vmul.f32 -1.442695, %v2864_v9 }
 0x9fa   :  { %7029 = vpow2.f32 %v5482_v20 }
 0xa02   :  { %v7028_v19 = vpop.eup %7027 }
 0xa03   :  { %2874 = vrot.lane.b32.xlu0 %v7028_v19, %s7098_s3 }
 0xa04   :  { %v7030_v26 = vpop.eup %7029 }
 0xa05   :  { %v2868_v27 = vadd.f32 1.0, %v7030_v26 }
 0xa07   :  { %7031 = vrcp.f32 %v2868_v27 }
 0xa11   :  { %v7032_v28 = vpop.eup %7031 }
 0xa12   :  { %v2872_v35 = vmul.f32 %v7032_v28, %v7551_v41 }
 0xa75   :  { %v2875_v29 = vpop.permute.xlu0 %2874 }
 0xa76   :  { %v2877_v30 = vmul.f32 %v7032_v28, %v2875_v29 }
 0xa78   :  { %2879 = vrot.lane.b32.xlu1 %v2877_v30, %s7099_s24 }
 0xaea   :  { %v2880_v36 = vpop.permute.xlu1 %2879 }
 0xaeb   :  { %v7597_v37 = vadd.f32 %v2880_v36, %v2872_v35 }
 0xaed   :  { %7033 = vtanh.f32 %v7597_v37 }
 0xaf7   :  { %v7034_v1 = vpop.eup %7033 }
 0xaf8   :  { %2885 = vrot.lane.b32.xlu0 %v7034_v1, %s7098_s3 }
 0xb6a   :  { %v2886_v42 = vpop.permute.xlu0 %2885 }
 0xb6b   :  { %v2888_v46 = vmul.f32 %v7032_v28, %v2886_v42 }
 0xb6d   :  { %2890 = vrot.lane.b32.xlu1 %v2888_v46, %s7099_s24 }
 0xbdf   :  { %v2891_v51 = vpop.permute.xlu1 %2890 }
 0xbe0   :  { %v2892_v57 = vsel %vm830_vm2, %v2891_v51, 0 }
 0xbe1   :  { %v2963_v58 = vand.u32 4294901760, %v2892_v57 }
 0xbe3   :  { %v2964_v59 = vsub.f32 %v2892_v57, %v2963_v58 }
 0xbe5   :  { %v2965_v60 = vand.u32 4294901760, %v2964_v59 }
 0xbe7   :  { %v2966_v61 = vsub.f32 %v2964_v59, %v2965_v60 }
 0xbe9   :  { %v2967_v62 = vand.u32 4294901760, %v2966_v61 }
 0xbeb   :  { %6187 = vmatmul.mubr.f32.vlgmr.msra.gmra.mrb[10].mxu0 %v2967_v62 }
 0xbec   :  { %6684 = vmatpush3.bf16.msra.mxu0 %v7329_v50  ;;  %6197 = vmatprep.mubr.msk.f32.mxu0 %vm7096_vm1, %v7097_v54 }
 0xbed   :  { %6685 = vmatprep.subr.bf16.mxu0 %v7095_v7 }
 0xbf0   :  { %6687 = vmatpush3.bf16.msra.mxu0 %v7339_v55 }
 0xbf1   :  { %6688 = vmatprep.subr.bf16.mxu0 %v7095_v7 }
 0xbf3   :  { %6198 = vmatmul.mubr.f32.vlgmr.msra.gmra.mrb[10].mxu0 %v2963_v58 }
 0xbf4   :  { %6690 = vmatpush3.bf16.msra.mxu0 %v7349_v56  ;;  %6208 = vmatprep.mubr.msk.f32.mxu0 %vm7096_vm1, %v7097_v54 }
 0xbf5   :  { %6691 = vmatprep.subr.bf16.mxu0 %v7095_v7 }
 0xbf8   :  { %6693 = vmatpush3.bf16.msra.mxu0 %v7363_v18 }
 0xbf9   :  { %6694 = vmatprep.subr.bf16.mxu0 %v7095_v7 }
 0xbfb   :  { %6209 = vmatmul.mubr.f32.vlgmr.msra.gmra.mrb[10].mxu0 %v2964_v59 }
 0xbfc   :  { %6696 = vmatpush3.bf16.msra.mxu0 %v7298_v43  ;;  %6219 = vmatprep.mubr.msk.f32.mxu0 %vm7096_vm1, %v7097_v54 }
 0xbfd   :  { %6697 = vmatprep.subr.bf16.mxu0 %v7095_v7 }
 0xc00   :  { %6699 = vmatpush3.bf16.msra.mxu0 %v7313_v25 }
 0xc01   :  { %6700 = vmatprep.subr.bf16.mxu0 %v7095_v7 }
 0xc03   :  { %6220 = vmatmul.mubr.f32.vlgmr.msra.gmra.mrb[10].mxu0 %v2965_v60 }
 0xc04   :  { %6702 = vmatpush3.bf16.msra.mxu0 %v7389_v23  ;;  %6230 = vmatprep.mubr.msk.f32.mxu0 %vm7096_vm1, %v7097_v54 }
 0xc05   :  { %6703 = vmatprep.subr.bf16.mxu0 %v7095_v7 }
 0xc08   :  { %6705 = vmatpush3.bf16.msra.mxu0 %v7402_v14 }
 0xc09   :  { %6706 = vmatprep.subr.bf16.mxu0 %v7095_v7 }
 0xc0b   :  { %6231 = vmatmul.mubr.f32.vlgmr.msra.gmra.mrb[10].mxu0 %v2963_v58 }
 0xc0c   :  { %6708 = vmatpush3.bf16.msra.mxu0 %v7298_v43  ;;  %6241 = vmatprep.mubr.msk.f32.mxu0 %vm7096_vm1, %v7097_v54 }
 0xc0d   :  { %6709 = vmatprep.subr.bf16.mxu0 %v7095_v7 }
 0xc10   :  { %6711 = vmatpush3.bf16.msra.mxu0 %v7313_v25 }
 0xc11   :  { %6748 = vmatprep.subr.bf16.mxu0 %v7095_v7 }
 0xc13   :  { %6242 = vmatmul.mubr.f32.vlgmr.msra.gmra.mrb[10].mxu0 %v2963_v58 }
 0xc14   :  { %6750 = vmatpush3.bf16.msra.mxu0 %v7298_v43  ;;  %6318 = vmatprep.mubr.msk.f32.mxu0 %vm7096_vm1, %v7097_v54 }
 0xc15   :  { %6751 = vmatprep.subr.bf16.mxu0 %v7095_v7 }
 0xc18   :  { %6753 = vmatpush3.bf16.msra.mxu0 %v7313_v25 }
 0xc19   :  { %6754 = vmatprep.subr.bf16.mxu0 %v7095_v7 }
 0xce6   :  { %v3375_v63 = vpop.f32.mrb[10].mxu0 }
 0xce7   :  { %v3379_v0 = vadd.f32 %v7451_v11, %v3375_v63  ;;  %v6243_v2 = vpop.f32.mrb[11].mxu0 }
 0xce9   :  { %7035 = vtanh.f32 %v3379_v0  ;;  %v5483_v4 = vmul.f32 -1.442695, %v3379_v0 }
 0xceb   :  { %7037 = vpow2.f32 %v5483_v4 }
 0xcf3   :  { %v7036_v3 = vpop.eup %7035 }
 0xcf4   :  { %3389 = vrot.lane.b32.xlu0 %v7036_v3, %s7098_s3 }
 0xcf5   :  { %v7038_v6 = vpop.eup %7037 }
 0xcf6   :  { %v3383_v10 = vadd.f32 1.0, %v7038_v6 }
 0xcf8   :  { %7039 = vrcp.f32 %v3383_v10 }
 0xd02   :  { %v7040_v12 = vpop.eup %7039 }
 0xd03   :  { %v3387_v32 = vmul.f32 %v7040_v12, %v7597_v37 }
 0xd66   :  { %v3390_v21 = vpop.permute.xlu0 %3389 }
 0xd67   :  { %v3392_v31 = vmul.f32 %v7040_v12, %v3390_v21 }
 0xd69   :  { %3394 = vrot.lane.b32.xlu1 %v3392_v31, %s7099_s24 }
 0xddb   :  { %v3395_v33 = vpop.permute.xlu1 %3394 }
 0xddc   :  { %v7643_v34 = vadd.f32 %v3395_v33, %v3387_v32 }
 0xdde   :  { %7041 = vtanh.f32 %v7643_v34 }
 0xde8   :  { %v7042_v11 = vpop.eup %7041 }
 0xde9   :  { %3400 = vrot.lane.b32.xlu0 %v7042_v11, %s7098_s3 }
 0xe5b   :  { %v3401_v38 = vpop.permute.xlu0 %3400 }
 0xe5c   :  { %v3403_v39 = vmul.f32 %v7040_v12, %v3401_v38 }
 0xe5e   :  { %3405 = vrot.lane.b32.xlu1 %v3403_v39, %s7099_s24 }
 0xed0   :  { %v3406_v40 = vpop.permute.xlu1 %3405 }
 0xed1   :  { %v3407_v41 = vsel %vm830_vm2, %v3406_v40, 0 }
 0xed2   :  { %v3478_v5 = vand.u32 4294901760, %v3407_v41 }
 0xed4   :  { %v3479_v44 = vsub.f32 %v3407_v41, %v3478_v5 }
 0xed6   :  { %v3480_v16 = vand.u32 4294901760, %v3479_v44 }
 0xed8   :  { %v3481_v17 = vsub.f32 %v3479_v44, %v3480_v16 }
 0xeda   :  { %v3482_v24 = vand.u32 4294901760, %v3481_v17  ;;  %v4949_v17 = vld [vmem:[%s7825_s4] sm:$0xff] }
 0xedc   :  { %6253 = vmatmul.mubr.f32.vlgmr.msra.gmra.mrb[14].mxu1 %v3482_v24  ;;  %v4950_v24 = vld [vmem:[%s7825_s4 + $0x8] sm:$0xff] }
 0xedd   :  { %6720 = vmatpush3.bf16.msra.mxu1 %v7329_v50  ;;  %6263 = vmatprep.mubr.msk.f32.mxu1 %vm7096_vm1, %v7097_v54 }
 0xede   :  { %6721 = vmatprep.subr.bf16.mxu1 %v7095_v7 }
 0xee1   :  { %6723 = vmatpush3.bf16.msra.mxu1 %v7339_v55 }
 0xee2   :  { %6724 = vmatprep.subr.bf16.mxu1 %v7095_v7 }
 0xee4   :  { %6264 = vmatmul.mubr.f32.vlgmr.msra.gmra.mrb[14].mxu1 %v3478_v5 }
 0xee5   :  { %6726 = vmatpush3.bf16.msra.mxu1 %v7349_v56  ;;  %6274 = vmatprep.mubr.msk.f32.mxu1 %vm7096_vm1, %v7097_v54 }
 0xee6   :  { %6727 = vmatprep.subr.bf16.mxu1 %v7095_v7 }
 0xee9   :  { %6729 = vmatpush3.bf16.msra.mxu1 %v7363_v18 }
 0xeea   :  { %6730 = vmatprep.subr.bf16.mxu1 %v7095_v7 }
 0xeec   :  { %6275 = vmatmul.mubr.f32.vlgmr.msra.gmra.mrb[14].mxu1 %v3479_v44 }
 0xeed   :  { %6732 = vmatpush3.bf16.msra.mxu1 %v7298_v43  ;;  %6285 = vmatprep.mubr.msk.f32.mxu1 %vm7096_vm1, %v7097_v54 }
 0xeee   :  { %6733 = vmatprep.subr.bf16.mxu1 %v7095_v7 }
 0xef1   :  { %6735 = vmatpush3.bf16.msra.mxu1 %v7313_v25 }
 0xef2   :  { %6736 = vmatprep.subr.bf16.mxu1 %v7095_v7 }
 0xef4   :  { %6286 = vmatmul.mubr.f32.vlgmr.msra.gmra.mrb[14].mxu1 %v3480_v16 }
 0xef5   :  { %6738 = vmatpush3.bf16.msra.mxu1 %v7389_v23  ;;  %6296 = vmatprep.mubr.msk.f32.mxu1 %vm7096_vm1, %v7097_v54 }
 0xef6   :  { %6739 = vmatprep.subr.bf16.mxu1 %v7095_v7 }
 0xef9   :  { %6741 = vmatpush3.bf16.msra.mxu1 %v7402_v14 }
 0xefa   :  { %6742 = vmatprep.subr.bf16.mxu1 %v7095_v7 }
 0xefc   :  { %6297 = vmatmul.mubr.f32.vlgmr.msra.gmra.mrb[14].mxu1 %v3478_v5 }
 0xefd   :  { %6744 = vmatpush3.bf16.msra.mxu1 %v7298_v43  ;;  %6307 = vmatprep.mubr.msk.f32.mxu1 %vm7096_vm1, %v7097_v54 }
 0xefe   :  { %6745 = vmatprep.subr.bf16.mxu1 %v7095_v7 }
 0xf01   :  { %6747 = vmatpush3.bf16.msra.mxu1 %v7313_v25 }
 0xf02   :  { %6784 = vmatprep.subr.bf16.mxu1 %v7095_v7 }
 0xf04   :  { %6308 = vmatmul.mubr.f32.vlgmr.msra.gmra.mrb[14].mxu1 %v3478_v5 }
 0xf05   :  { %6786 = vmatpush3.bf16.msra.mxu1 %v7298_v43  ;;  %6384 = vmatprep.mubr.msk.f32.mxu1 %vm7096_vm1, %v7097_v54 }
 0xf06   :  { %6787 = vmatprep.subr.bf16.mxu1 %v7095_v7 }
 0xf09   :  { %6789 = vmatpush3.bf16.msra.mxu1 %v7313_v25 }
 0xf0a   :  { %6790 = vmatprep.subr.bf16.mxu1 %v7095_v7 }
 0xfd7   :  { %v3890_v45 = vpop.f32.mrb[14].mxu1 }
 0xfd8   :  { %v3894_v47 = vadd.f32 %v7449_v8, %v3890_v45  ;;  %v6309_v48 = vpop.f32.mrb[15].mxu1  ;;  %v4966_v45 = vand.u32 4294901760, %v4949_v17 }
 0xfda   :  { %7043 = vtanh.f32 %v3894_v47  ;;  %v5484_v52 = vmul.f32 -1.442695, %v3894_v47  ;;  %v4969_v47 = vand.u32 4294901760, %v4950_v24 }
 0xfdc   :  { %7045 = vpow2.f32 %v5484_v52  ;;  %v7769_v48 = vpack.c.bf16 %v4969_v47, %v4966_v45  ;;  %v5053_v52 = vsub.f32 %v4950_v24, %v4969_v47 }
 0xfe4   :  { %v7044_v49 = vpop.eup %7043 }
 0xfe5   :  { %3904 = vrot.lane.b32.xlu0 %v7044_v49, %s7098_s3  ;;  %v5046_v49 = vsub.f32 %v4949_v17, %v4966_v45 }
 0xfe6   :  { %v7046_v53 = vpop.eup %7045 }
 0xfe7   :  { %v3898_v9 = vadd.f32 1.0, %v7046_v53  ;;  %v4951_v53 = vld [vmem:[%s7825_s4 + $0x10] sm:$0xff] }
 0xfe9   :  { %7047 = vrcp.f32 %v3898_v9  ;;  %v4952_v9 = vld [vmem:[%s7825_s4 + $0x18] sm:$0xff] }
 0xff3   :  { %v7048_v15 = vpop.eup %7047 }
 0xff4   :  { %v3902_v26 = vmul.f32 %v7048_v15, %v7643_v34 }
0x1057   :  { %v3905_v19 = vpop.permute.xlu0 %3904 }
0x1058   :  { %v3907_v20 = vmul.f32 %v7048_v15, %v3905_v19  ;;  %v4975_v19 = vand.u32 4294901760, %v4952_v9 }
0x105a   :  { %3909 = vrot.lane.b32.xlu1 %v3907_v20, %s7099_s24  ;;  %v5047_v20 = vand.u32 4294901760, %v5046_v49 }
0x10cc   :  { %v3910_v27 = vpop.permute.xlu1 %3909 }
0x10cd   :  { %v3912_v28 = vadd.f32 %v3910_v27, %v3902_v26  ;;  %v5054_v26 = vand.u32 4294901760, %v5053_v52 }
0x10cf   :  { %7049 = vtanh.f32 %v3912_v28 }
0x10d9   :  { %v7050_v8 = vpop.eup %7049 }
0x10da   :  { %3915 = vrot.lane.b32.xlu0 %v7050_v8, %s7098_s3  ;;  %v5067_v8 = vsub.f32 %v4952_v9, %v4975_v19 }
0x114c   :  { %v3916_v29 = vpop.permute.xlu0 %3915 }
0x114d   :  { %v3918_v30 = vmul.f32 %v7048_v15, %v3916_v29  ;;  %v4972_v15 = vand.u32 4294901760, %v4951_v53  ;;  %v5048_v29 = vsub.f32 %v5046_v49, %v5047_v20 }
0x114f   :  { %3920 = vrot.lane.b32.xlu1 %v3918_v30, %s7099_s24  ;;  %v6824_v27 = vpack.c.bf16 %v4975_v19, %v4972_v15  ;;  %v5055_v30 = vsub.f32 %v5053_v52, %v5054_v26 }
0x11c1   :  { %v3921_v35 = vpop.permute.xlu1 %3920 }
0x11c2   :  { %v3922_v36 = vsel %vm830_vm2, %v3921_v35, 0  ;;  %v5049_v35 = vand.u32 4294901760, %v5048_v29 }
0x11c3   :  { %v3993_v37 = vand.u32 4294901760, %v3922_v36 }
0x11c5   :  { %v3994_v1 = vsub.f32 %v3922_v36, %v3993_v37 }
0x11c7   :  { %v3995_v42 = vand.u32 4294901760, %v3994_v1 }
0x11c9   :  { %v3996_v46 = vsub.f32 %v3994_v1, %v3995_v42 }
0x11cb   :  { %v3997_v51 = vand.u32 4294901760, %v3996_v46 }
0x11cd   :  { %6319 = vmatmul.mubr.f32.vlgmr.msra.gmra.mrb[12].mxu0 %v3997_v51 }
0x11ce   :  { %6756 = vmatpush3.bf16.msra.mxu0 %v7329_v50  ;;  %6329 = vmatprep.mubr.msk.f32.mxu0 %vm7096_vm1, %v7097_v54 }
0x11cf   :  { %6757 = vmatprep.subr.bf16.mxu0 %v7095_v7 }
0x11d2   :  { %6759 = vmatpush3.bf16.msra.mxu0 %v7339_v55 }
0x11d3   :  { %6760 = vmatprep.subr.bf16.mxu0 %v7095_v7 }
0x11d5   :  { %6330 = vmatmul.mubr.f32.vlgmr.msra.gmra.mrb[12].mxu0 %v3993_v37 }
0x11d6   :  { %6762 = vmatpush3.bf16.msra.mxu0 %v7349_v56  ;;  %6340 = vmatprep.mubr.msk.f32.mxu0 %vm7096_vm1, %v7097_v54 }
0x11d7   :  { %6763 = vmatprep.subr.bf16.mxu0 %v7095_v7 }
0x11da   :  { %6765 = vmatpush3.bf16.msra.mxu0 %v7363_v18 }
0x11db   :  { %6766 = vmatprep.subr.bf16.mxu0 %v7095_v7 }
0x11dd   :  { %6341 = vmatmul.mubr.f32.vlgmr.msra.gmra.mrb[12].mxu0 %v3994_v1  ;;  %v5056_v1 = vand.u32 4294901760, %v5055_v30 }
0x11de   :  { %6768 = vmatpush3.bf16.msra.mxu0 %v7298_v43  ;;  %6351 = vmatprep.mubr.msk.f32.mxu0 %vm7096_vm1, %v7097_v54 }
0x11df   :  { %6769 = vmatprep.subr.bf16.mxu0 %v7095_v7 }
0x11e2   :  { %6771 = vmatpush3.bf16.msra.mxu0 %v7313_v25 }
0x11e3   :  { %6772 = vmatprep.subr.bf16.mxu0 %v7095_v7 }
0x11e5   :  { %6352 = vmatmul.mubr.f32.vlgmr.msra.gmra.mrb[12].mxu0 %v3995_v42 }
0x11e6   :  { %6774 = vmatpush3.bf16.msra.mxu0 %v7389_v23  ;;  %6362 = vmatprep.mubr.msk.f32.mxu0 %vm7096_vm1, %v7097_v54 }
0x11e7   :  { %6775 = vmatprep.subr.bf16.mxu0 %v7095_v7 }
0x11ea   :  { %6777 = vmatpush3.bf16.msra.mxu0 %v7402_v14 }
0x11eb   :  { %6778 = vmatprep.subr.bf16.mxu0 %v7095_v7 }
0x11ed   :  { %6363 = vmatmul.mubr.f32.vlgmr.msra.gmra.mrb[12].mxu0 %v3993_v37 }
0x11ee   :  { %6780 = vmatpush3.bf16.msra.mxu0 %v7298_v43  ;;  %6373 = vmatprep.mubr.msk.f32.mxu0 %vm7096_vm1, %v7097_v54 }
0x11ef   :  { %6781 = vmatprep.subr.bf16.mxu0 %v7095_v7 }
0x11f2   :  { %6783 = vmatpush3.bf16.msra.mxu0 %v7313_v25 }
0x11f3   :  { %6820 = vmatprep.subr.bf16.mxu0 %v7095_v7 }
0x11f5   :  { %6374 = vmatmul.mubr.f32.vlgmr.msra.gmra.mrb[12].mxu0 %v3993_v37  ;;  %v5068_v37 = vand.u32 4294901760, %v5067_v8 }
0x11f6   :  { %6450 = vmatprep.mubr.msk.f32.mxu0 %vm7096_vm1, %v7097_v54  ;;  %6822 = vmatpush3.bf16.msra.mxu0 %v7769_v48 }
0x11f7   :  { %6823 = vmatprep.subr.bf16.mxu0 %v7095_v7  ;;  %v5069_v51 = vsub.f32 %v5067_v8, %v5068_v37 }
0x11fa   :  { %6825 = vmatpush3.bf16.msra.mxu0 %v6824_v27 }
0x11fb   :  { %6826 = vmatprep.subr.bf16.mxu0 %v7095_v7 }
0x12c8   :  { %v4405_v57 = vpop.f32.mrb[12].mxu0 }
0x12c9   :  { %v4409_v58 = vadd.f32 %v7455_v22, %v4405_v57  ;;  %v6375_v59 = vpop.f32.mrb[13].mxu0 }
0x12cb   :  { %7051 = vtanh.f32 %v4409_v58  ;;  %v5485_v61 = vmul.f32 -1.442695, %v4409_v58  ;;  %v6827_v58 = vpack.c.bf16 %v5056_v1, %v5049_v35 }
0x12cd   :  { %7053 = vpow2.f32 %v5485_v61 }
0x12d5   :  { %v7052_v60 = vpop.eup %7051 }
0x12d6   :  { %4419 = vrot.lane.b32.xlu0 %v7052_v60, %s7098_s3  ;;  %v5070_v60 = vand.u32 4294901760, %v5069_v51 }
0x12d7   :  { %v7054_v62 = vpop.eup %7053 }
0x12d8   :  { %v4413_v63 = vadd.f32 1.0, %v7054_v62  ;;  %v6833_v62 = vpack.c.bf16 %v5053_v52, %v5046_v49 }
0x12da   :  { %7055 = vrcp.f32 %v4413_v63 }
0x12e4   :  { %v7056_v0 = vpop.eup %7055 }
0x12e5   :  { %v4417_v4 = vmul.f32 %v7056_v0, %v3912_v28  ;;  %v5060_v28 = vsub.f32 %v4951_v53, %v4972_v15 }
0x12e7   :  { %v5061_v36 = vand.u32 4294901760, %v5060_v28  ;;  %v6836_v63 = vpack.c.bf16 %v5067_v8, %v5060_v28 }
0x12e9   :  { %v5062_v46 = vsub.f32 %v5060_v28, %v5061_v36 }
0x12eb   :  { %v5063_v59 = vand.u32 4294901760, %v5062_v46 }
0x12ed   :  { %v6830_v61 = vpack.c.bf16 %v5070_v60, %v5063_v59 }
0x1348   :  { %v4420_v2 = vpop.permute.xlu0 %4419 }
0x1349   :  { %v4422_v3 = vmul.f32 %v7056_v0, %v4420_v2  ;;  %v6848_v2 = vpack.c.bf16 %v5068_v37, %v5061_v36 }
0x134b   :  { %4424 = vrot.lane.b32.xlu1 %v4422_v3, %s7099_s24 }
0x13bd   :  { %v4425_v6 = vpop.permute.xlu1 %4424 }
0x13be   :  { %v4427_v10 = vadd.f32 %v4425_v6, %v4417_v4 }
0x13c0   :  { %7057 = vtanh.f32 %v4427_v10 }
0x13ca   :  { %v7058_v22 = vpop.eup %7057 }
0x13cb   :  { %4430 = vrot.lane.b32.xlu0 %v7058_v22, %s7098_s3 }
0x143d   :  { %v4431_v12 = vpop.permute.xlu0 %4430 }
0x143e   :  { %v4433_v21 = vmul.f32 %v7056_v0, %v4431_v12  ;;  %v6845_v0 = vpack.c.bf16 %v5054_v26, %v5047_v20 }
0x1440   :  { %4435 = vrot.lane.b32.xlu1 %v4433_v21, %s7099_s24 }
0x14b2   :  { %v4436_v31 = vpop.permute.xlu1 %4435 }
0x14b3   :  { %v4437_v32 = vsel %vm830_vm2, %v4436_v31, 0  ;;  %v5487_v31 = vld [vmem:[%s7826_s5] ss:$0 sm:$0xff]  ;;  %s5470_s5 = sshll.u32 %s7100_s9, 4  ;;  %s5471_s5 = int_to_ptr.vmem [resolvable:$true] %s5470_s5 }
0x14b4   :  { %v4508_v33 = vand.u32 4294901760, %v4437_v32  ;;  %s7071_s10 = scalar_lea.vmem %s5471_s5, 128  ;;  %p7076_p1 = scmp.lt.s32.totalorder %s5471_s5, %s5471_s5 }
0x14b5   :  { %p7072_p0 = scmp.ne.s32.totalorder %s5471_s5, %s7071_s10  ;;  %p7077_p2 = scmp.lt.s32.totalorder %s7071_s10, %s7071_s10 }
0x14b6   :  { %v4509_v34 = vsub.f32 %v4437_v32, %v4508_v33 }
0x14b7   :  { %p7078_p3 = por %p7077_p2, %p7076_p1 }
0x14b8   :  { %v4510_v11 = vand.u32 4294901760, %v4509_v34 }
0x14b9   :  { %p7079_p4 = pnand %p7078_p3, %p7072_p0 }
0x14ba   :  { %v4511_v38 = vsub.f32 %v4509_v34, %v4510_v11 }
0x14bc   :  { %v4512_v39 = vand.u32 4294901760, %v4511_v38 }
0x14be   :  { %6385 = vmatmul.mubr.f32.vlgmr.msra.gmra.mrb[16].mxu1 %v4512_v39 }
0x14bf   :  { %6792 = vmatpush3.bf16.msra.mxu1 %v7329_v50  ;;  %6395 = vmatprep.mubr.msk.f32.mxu1 %vm7096_vm1, %v7097_v54 }
0x14c0   :  { %6793 = vmatprep.subr.bf16.mxu1 %v7095_v7 }
0x14c3   :  { %6795 = vmatpush3.bf16.msra.mxu1 %v7339_v55 }
0x14c4   :  { %6796 = vmatprep.subr.bf16.mxu1 %v7095_v7 }
0x14c6   :  { %6396 = vmatmul.mubr.f32.vlgmr.msra.gmra.mrb[16].mxu1 %v4508_v33 }
0x14c7   :  { %6798 = vmatpush3.bf16.msra.mxu1 %v7349_v56  ;;  %6406 = vmatprep.mubr.msk.f32.mxu1 %vm7096_vm1, %v7097_v54 }
0x14c8   :  { %6799 = vmatprep.subr.bf16.mxu1 %v7095_v7 }
0x14cb   :  { %6801 = vmatpush3.bf16.msra.mxu1 %v7363_v18 }
0x14cc   :  { %6802 = vmatprep.subr.bf16.mxu1 %v7095_v7 }
0x14ce   :  { %6407 = vmatmul.mubr.f32.vlgmr.msra.gmra.mrb[16].mxu1 %v4509_v34 }
0x14cf   :  { %6804 = vmatpush3.bf16.msra.mxu1 %v7298_v43  ;;  %6417 = vmatprep.mubr.msk.f32.mxu1 %vm7096_vm1, %v7097_v54 }
0x14d0   :  { %6805 = vmatprep.subr.bf16.mxu1 %v7095_v7 }
0x14d3   :  { %6807 = vmatpush3.bf16.msra.mxu1 %v7313_v25 }
0x14d4   :  { %6808 = vmatprep.subr.bf16.mxu1 %v7095_v7 }
0x14d6   :  { %6418 = vmatmul.mubr.f32.vlgmr.msra.gmra.mrb[16].mxu1 %v4510_v11 }
0x14d7   :  { %6810 = vmatpush3.bf16.msra.mxu1 %v7389_v23  ;;  %6428 = vmatprep.mubr.msk.f32.mxu1 %vm7096_vm1, %v7097_v54 }
0x14d8   :  { %6811 = vmatprep.subr.bf16.mxu1 %v7095_v7 }
0x14db   :  { %6813 = vmatpush3.bf16.msra.mxu1 %v7402_v14 }
0x14dc   :  { %6814 = vmatprep.subr.bf16.mxu1 %v7095_v7 }
0x14de   :  { %6429 = vmatmul.mubr.f32.vlgmr.msra.gmra.mrb[16].mxu1 %v4508_v33 }
0x14df   :  { %6816 = vmatpush3.bf16.msra.mxu1 %v7298_v43  ;;  %6439 = vmatprep.mubr.msk.f32.mxu1 %vm7096_vm1, %v7097_v54 }
0x14e0   :  { %6817 = vmatprep.subr.bf16.mxu1 %v7095_v7 }
0x14e3   :  { %6819 = vmatpush3.bf16.msra.mxu1 %v7313_v25 }
0x14e6   :  { %6440 = vmatmul.mubr.f32.vlgmr.msra.gmra.mrb[16].mxu1 %v4508_v33 }
0x15b9   :  { %v4920_v50 = vpop.f32.mrb[16].mxu1 }
0x15ba   :  { %v4924_v55 = vadd.f32 %v7453_v13, %v4920_v50  ;;  %v6441_v56 = vpop.f32.mrb[17].mxu1 }
0x15bc   :  { %7059 = vtanh.f32 %v4924_v55  ;;  %v5486_v23 = vmul.f32 -1.442695, %v4924_v55 }
0x15be   :  { %7061 = vpow2.f32 %v5486_v23 }
0x15c6   :  { %v7060_v18 = vpop.eup %7059 }
0x15c7   :  { %4934 = vrot.lane.b32.xlu0 %v7060_v18, %s7098_s3 }
0x15c8   :  { %v7062_v14 = vpop.eup %7061 }
0x15c9   :  { %v4928_v43 = vadd.f32 1.0, %v7062_v14 }
0x15cb   :  { %7063 = vrcp.f32 %v4928_v43 }
0x15d5   :  { %v7064_v40 = vpop.eup %7063 }
0x15d6   :  { %v4932_v25 = vmul.f32 %v7064_v40, %v4427_v10 }
0x1639   :  { %v4935_v41 = vpop.permute.xlu0 %4934 }
0x163a   :  { %v4937_v5 = vmul.f32 %v7064_v40, %v4935_v41 }
0x163c   :  { %4939 = vrot.lane.b32.xlu1 %v4937_v5, %s7099_s24 }
0x16ae   :  { %v4940_v44 = vpop.permute.xlu1 %4939 }
0x16af   :  { %v4942_v16 = vadd.f32 %v4940_v44, %v4932_v25 }
0x16b1   :  { %7065 = vtanh.f32 %v4942_v16 }
0x16bb   :  { %v7066_v13 = vpop.eup %7065 }
0x16bc   :  { %4945 = vrot.lane.b32.xlu0 %v7066_v13, %s7098_s3 }
0x172e   :  { %v4946_v42 = vpop.permute.xlu0 %4945 }
0x172f   :  { %v4948_v57 = vmul.f32 %v7064_v40, %v4946_v42 }
0x1731   :  { %4961 = vrot.lane.b32.xlu1 %v4948_v57, %s7099_s24 }
0x17a3   :  { %v4962_v3 = vpop.permute.xlu1 %4961 }
0x17a4   :  { %v4963_v4 = vsel %vm830_vm2, %v4962_v3, 0 }
0x17a5   :  { %v5034_v6 = vand.u32 4294901760, %v4963_v4 }
0x17a7   :  { %v5035_v10 = vsub.f32 %v4963_v4, %v5034_v6 }
0x17a9   :  { %v5036_v22 = vand.u32 4294901760, %v5035_v10 }
0x17ab   :  { %v5037_v12 = vsub.f32 %v5035_v10, %v5036_v22 }
0x17ad   :  { %v5038_v21 = vand.u32 4294901760, %v5037_v12 }
0x17af   :  { %6451 = vmatmul.mubr.f32.vlgmr.msra.gmra.mrb[14].mxu0 %v5038_v21 }
0x17b0   :  { %6828 = vmatpush3.bf16.msra.mxu0 %v6827_v58  ;;  %6461 = vmatprep.mubr.msk.f32.mxu0 %vm7096_vm1, %v7097_v54 }
0x17b1   :  { %6829 = vmatprep.subr.bf16.mxu0 %v7095_v7 }
0x17b4   :  { %6831 = vmatpush3.bf16.msra.mxu0 %v6830_v61 }
0x17b5   :  { %6832 = vmatprep.subr.bf16.mxu0 %v7095_v7 }
0x17b7   :  { %6462 = vmatmul.mubr.f32.vlgmr.msra.gmra.mrb[14].mxu0 %v5034_v6 }
0x17b8   :  { %6834 = vmatpush3.bf16.msra.mxu0 %v6833_v62  ;;  %6472 = vmatprep.mubr.msk.f32.mxu0 %vm7096_vm1, %v7097_v54 }
0x17b9   :  { %6835 = vmatprep.subr.bf16.mxu0 %v7095_v7 }
0x17bc   :  { %6837 = vmatpush3.bf16.msra.mxu0 %v6836_v63 }
0x17bd   :  { %6838 = vmatprep.subr.bf16.mxu0 %v7095_v7 }
0x17bf   :  { %6473 = vmatmul.mubr.f32.vlgmr.msra.gmra.mrb[14].mxu0 %v5035_v10 }
0x17c0   :  { %6840 = vmatpush3.bf16.msra.mxu0 %v7769_v48  ;;  %6483 = vmatprep.mubr.msk.f32.mxu0 %vm7096_vm1, %v7097_v54 }
0x17c1   :  { %6841 = vmatprep.subr.bf16.mxu0 %v7095_v7 }
0x17c4   :  { %6843 = vmatpush3.bf16.msra.mxu0 %v6824_v27 }
0x17c5   :  { %6844 = vmatprep.subr.bf16.mxu0 %v7095_v7 }
0x17c7   :  { %6484 = vmatmul.mubr.f32.vlgmr.msra.gmra.mrb[14].mxu0 %v5036_v22 }
0x17c8   :  { %6846 = vmatpush3.bf16.msra.mxu0 %v6845_v0  ;;  %6494 = vmatprep.mubr.msk.f32.mxu0 %vm7096_vm1, %v7097_v54 }
0x17c9   :  { %6847 = vmatprep.subr.bf16.mxu0 %v7095_v7 }
0x17cc   :  { %6849 = vmatpush3.bf16.msra.mxu0 %v6848_v2 }
0x17cd   :  { %6850 = vmatprep.subr.bf16.mxu0 %v7095_v7 }
0x17cf   :  { %6495 = vmatmul.mubr.f32.vlgmr.msra.gmra.mrb[14].mxu0 %v5034_v6 }
0x17d0   :  { %6852 = vmatpush3.bf16.msra.mxu0 %v7769_v48  ;;  %6505 = vmatprep.mubr.msk.f32.mxu0 %vm7096_vm1, %v7097_v54 }
0x17d1   :  { %6853 = vmatprep.subr.bf16.mxu0 %v7095_v7 }
0x17d4   :  { %6855 = vmatpush3.bf16.msra.mxu0 %v6824_v27 }
0x17d7   :  { %6506 = vmatmul.mubr.f32.vlgmr.msra.gmra.mrb[14].mxu0 %v5034_v6 }
0x18aa   :  { %v5446_v32 = vpop.f32.mrb[14].mxu0 }
0x18ab   :  { %v6874_v33 = vadd.f32 %v5487_v31, %v5446_v32  ;;  %v6507_v34 = vpop.f32.mrb[15].mxu0 }
0x18ad   :  { %v5451_v11 = vsel %vm5450_vm3, %v6874_v33, -inf }
0x18ae   :  { %5452 = vmax.xlane.f32.xlu0 %v5451_v11 }
0x193b   :  { %v5453_v38 = vpop.xlane.xlu0 %5452 }
0x193c   :  { %v5454_v39 = vsub.f32 %v6874_v33, %v5453_v38 }
0x193e   :  { %v5455_v50 = vmul.f32 1.442695, %v5454_v39 }
0x1940   :  { %7067 = vpow2.f32 %v5455_v50 }
0x194a   :  { %v7068_v54 = vpop.eup %7067 }
0x194b   :  { %v5457_v7 = vsel %vm5450_vm3, %v7068_v54, 0.0 }
0x194c   :  { %5458 = vadd.xlane.f32.xlu1 %v5457_v7 }
0x19d9   :  { %v5459_v55 = vpop.xlane.xlu1 %5458 }
0x19da   :  { %7069 = vlog2.f32 %v5459_v55 }
0x19e4   :  { %v7070_v56 = vpop.eup %7069 }
0x19e5   :  { %v5461_v18 = vmul.f32 0.6931472, %v7070_v56 }
0x19e7   :  { %v5462_v23 = vsub.f32 %v5454_v39, %v5461_v18 }
0x19e9   :  { %5463 = vst.msk [vmem:[#allocation2] sm:$0xff] %vm5450_vm3, %v5462_v23 }
0x19ea   :  { %7082 = shalt.err (!%p7079_p4)
}
0x19eb   :  { %s7083_s13 = scalar_lea.hbm %s7827_s6, 128 }
0x19ec   :  { %p7084_p5 = scmp.ne.s32.totalorder %s7827_s6, %s7083_s13  ;;  %p7087_p6 = scmp.lt.u32.totalorder %s7083_s13, %s7827_s6 }
0x19ee   :  { %p7089_p7 = pnand %p7087_p6, %p7084_p5 }
0x19f0   :  { %7092 = shalt.err (!%p7089_p7)
}
0x19f1   :  { %5473 = dma.vmem_to_hbm [thread:$0]  %s5471_s5, 128, %s7827_s6, [#allocation3]  }
0x19f2   :  { %7093 = dma.done.wait [#allocation3], 128  }
0x19f3   :  { %7094 = vsyncadd [#allocation3], 4294967168 }
0x19f4   :  { %5477 = vsyncpa [#allocation3], 1 }

</bundles_post_ra>
